<compile_context>
chip_gen: v5e
topology: v5e:2x2
jax: 0.10.0
libtpu: 0.0.40
codegen_flags: <defaults>
</compile_context>

<pallas_src>
import functools

import jax
import jax.numpy as jnp
from jax.experimental import pallas as pl
from jax.experimental.pallas import tpu as pltpu

HIDDEN = 256


def critic_kernel(x_ref, w1_ref, b1_ref, w2_ref, b2_ref, w3_ref, b3_ref,
                  w4_ref, b4_ref, out_ref):
    # x_ref: (TILE_B, obs+goal+act) bf16, already includes the folded
    # 1/max_action scaling inside w1's action rows.
    h = jnp.dot(x_ref[...], w1_ref[...], preferred_element_type=jnp.float32)
    h = jnp.maximum(h + b1_ref[...], 0.0)                      # relu(fc1), f32

    h = jnp.dot(h.astype(jnp.bfloat16), w2_ref[...],
                preferred_element_type=jnp.float32)
    h = jnp.maximum(h + b2_ref[...], 0.0)                      # relu(fc2), f32

    h = jnp.dot(h.astype(jnp.bfloat16), w3_ref[...],
                preferred_element_type=jnp.float32)
    h = jnp.maximum(h + b3_ref[...], 0.0)                      # relu(fc3), f32

    # q_out (256 -> 1): VPU multiply + lane reduce instead of a 1-lane matmul.
    out_ref[...] = jnp.sum(h * w4_ref[...], axis=-1, keepdims=True) + b4_ref[...]


def _round_up(n, m):
    return ((n + m - 1) // m) * m


@functools.partial(jax.jit, static_argnames=("tile_b",))
def critic_forward(x, actions, params, *, tile_b=128):
    """x: (B, obs+goal) f32; actions: (B, action) f32 -> (B, 1) f32."""
    B = x.shape[0]
    # Single concatenated input; action scaling already folded into w1.
    x_cat = jnp.concatenate([x, actions], axis=1).astype(jnp.bfloat16)
    d_xa = x_cat.shape[1]

    # Batch tile: multiple of 8 (sublane), capped at tile_b; pad batch to it.
    tb = min(tile_b, _round_up(B, 8))
    Bp = _round_up(B, tb)
    if Bp != B:
        x_cat = jnp.pad(x_cat, ((0, Bp - B), (0, 0)))

    grid = (Bp // tb,)
    batch_spec = pl.BlockSpec((tb, d_xa), lambda i: (i, 0))
    out_spec = pl.BlockSpec((tb, 1), lambda i: (i, 0))

    def const_spec(arr):
        # Full-extent block, constant index map -> stays resident in VMEM.
        return pl.BlockSpec(arr.shape, lambda i: (0, 0))

    w_args = (params["w1"], params["b1"],
              params["w2"], params["b2"],
              params["w3"], params["b3"],
              params["w4_row"], params["b4"])

    flops = 2 * Bp * (d_xa * HIDDEN + 2 * HIDDEN * HIDDEN + HIDDEN)
    bytes_accessed = (int(x_cat.size) * 2 + Bp * 4 +
                      sum(int(a.size) * a.dtype.itemsize for a in w_args))

    q = pl.pallas_call(
        critic_kernel,
        out_shape=jax.ShapeDtypeStruct((Bp, 1), jnp.float32),
        grid=grid,
        in_specs=[batch_spec] + [const_spec(a) for a in w_args],
        out_specs=out_spec,
        compiler_params=pltpu.CompilerParams(
            dimension_semantics=("parallel",)),
        cost_estimate=pl.CostEstimate(flops=flops, transcendentals=0,
                                      bytes_accessed=bytes_accessed),
    )(x_cat, *w_args)
    return q[:B]


def init_params(key, obs_dim, goal_dim, act_dim, max_action):
    """PyTorch-default-style init; folds 1/max_action into w1, bf16 weights."""
    d_og = obs_dim + goal_dim
    d_in = d_og + act_dim
    ks = jax.random.split(key, 8)

    def lin(kw, kb, fan_in, fan_out):
        bound = 1.0 / float(fan_in) ** 0.5
        w = jax.random.uniform(kw, (fan_in, fan_out), jnp.float32, -bound, bound)
        b = jax.random.uniform(kb, (1, fan_out), jnp.float32, -bound, bound)
        return w, b

    w1, b1 = lin(ks[0], ks[1], d_in, HIDDEN)      # fc1
    w2, b2 = lin(ks[2], ks[3], HIDDEN, HIDDEN)    # fc2
    w3, b3 = lin(ks[4], ks[5], HIDDEN, HIDDEN)    # fc3
    w4, b4 = lin(ks[6], ks[7], HIDDEN, 1)         # q_out

    # Fold the actions / max_action scaling into w1's action rows (one-time).
    row_scale = jnp.concatenate(
        [jnp.ones((d_og, 1), jnp.float32),
         jnp.full((act_dim, 1), 1.0 / float(max_action), jnp.float32)], axis=0)
    w1 = w1 * row_scale

    return {
        "w1": w1.astype(jnp.bfloat16), "b1": b1,
        "w2": w2.astype(jnp.bfloat16), "b2": b2,
        "w3": w3.astype(jnp.bfloat16), "b3": b3,
        "w4_row": w4.T,   # (1, 256) f32 row for the VPU reduce
        "b4": b4,         # (1, 1) f32
    }


if __name__ == "__main__":
    # env_params consistent with a small HER/FetchReach-style env
    env_params = {"obs": 10, "goal": 3, "action": 4, "action_max": 2.0}
    batch = 200  # not a multiple of the tile -> exercises batch padding

    key = jax.random.PRNGKey(0)
    k_p, k_x, k_a = jax.random.split(key, 3)

    params = init_params(k_p, env_params["obs"], env_params["goal"],
                         env_params["action"], env_params["action_max"])
    x = jax.random.normal(k_x, (batch, env_params["obs"] + env_params["goal"]),
                          jnp.float32)
    actions = jax.random.normal(k_a, (batch, env_params["action"]), jnp.float32)

    q = critic_forward(x, actions, params, tile_b=128)
    q = jax.block_until_ready(q)

    # pure-JAX reference (same bf16-quantized weights / input, f32 math).
    # w1 already contains the 1/max_action folding, so this matches the
    # PyTorch forward cat([x, actions/max_action]) @ W1.T + b1 ... semantics.
    xc = jnp.concatenate([x, actions], axis=1).astype(jnp.bfloat16)
    xc = xc.astype(jnp.float32)
    h = jnp.maximum(xc @ params["w1"].astype(jnp.float32) + params["b1"], 0.0)
    h = jnp.maximum(h @ params["w2"].astype(jnp.float32) + params["b2"], 0.0)
    h = jnp.maximum(h @ params["w3"].astype(jnp.float32) + params["b3"], 0.0)
    q_ref = h @ params["w4_row"].T + params["b4"]

    assert q.shape == (batch, 1)
    assert bool(jnp.all(jnp.isfinite(q)))
    assert jnp.allclose(q, q_ref, atol=2e-2, rtol=2e-2), \
        float(jnp.max(jnp.abs(q - q_ref)))

    print("KERNEL_OK")
</pallas_src>

<mosaic_0001>
module attributes {stable_mosaic.version = 11 : i64} {
  func.func @critic_kernel(%arg0: i32, %arg1: memref<128x17xbf16, #tpu.memory_space<vmem>>, %arg2: memref<17x256xbf16, #tpu.memory_space<vmem>>, %arg3: memref<1x256xf32, #tpu.memory_space<vmem>>, %arg4: memref<256x256xbf16, #tpu.memory_space<vmem>>, %arg5: memref<1x256xf32, #tpu.memory_space<vmem>>, %arg6: memref<256x256xbf16, #tpu.memory_space<vmem>>, %arg7: memref<1x256xf32, #tpu.memory_space<vmem>>, %arg8: memref<1x256xf32, #tpu.memory_space<vmem>>, %arg9: memref<1x1xf32, #tpu.memory_space<vmem>>, %arg10: memref<128x1xf32, #tpu.memory_space<vmem>>) attributes {dimension_semantics = [#tpu.dimension_semantics<parallel>], iteration_bounds = array<i64: 2>, scalar_prefetch = 0 : i64, scratch_operands = 0 : i64, tpu.core_type = #tpu.core_type<tc>, window_params = [{transform_indices = @transform_0, window_bounds = array<i64: 128, 17>}, {pipeline_mode = #tpu.pipeline_mode<synchronous>, transform_indices = @transform_1, window_bounds = array<i64: 17, 256>}, {pipeline_mode = #tpu.pipeline_mode<synchronous>, transform_indices = @transform_2, window_bounds = array<i64: 1, 256>}, {pipeline_mode = #tpu.pipeline_mode<synchronous>, transform_indices = @transform_3, window_bounds = array<i64: 256, 256>}, {pipeline_mode = #tpu.pipeline_mode<synchronous>, transform_indices = @transform_4, window_bounds = array<i64: 1, 256>}, {pipeline_mode = #tpu.pipeline_mode<synchronous>, transform_indices = @transform_5, window_bounds = array<i64: 256, 256>}, {pipeline_mode = #tpu.pipeline_mode<synchronous>, transform_indices = @transform_6, window_bounds = array<i64: 1, 256>}, {pipeline_mode = #tpu.pipeline_mode<synchronous>, transform_indices = @transform_7, window_bounds = array<i64: 1, 256>}, {pipeline_mode = #tpu.pipeline_mode<synchronous>, transform_indices = @transform_8, window_bounds = array<i64: 1, 1>}, {transform_indices = @transform_9, window_bounds = array<i64: 128, 1>}]} {
    %c0 = arith.constant 0 : index
    %c0_0 = arith.constant 0 : index
    %0 = vector.load %arg1[%c0, %c0_0] : memref<128x17xbf16, #tpu.memory_space<vmem>>, vector<128x17xbf16>
    %c0_1 = arith.constant 0 : index
    %c0_2 = arith.constant 0 : index
    %1 = vector.load %arg2[%c0_1, %c0_2] : memref<17x256xbf16, #tpu.memory_space<vmem>>, vector<17x256xbf16>
    %cst = arith.constant dense<0.000000e+00> : vector<128x256xf32>
    %2 = tpu.matmul %0, %1, %cst {dimension_numbers = #tpu.dot_dimension_numbers<[1], [0], [0], [1], [0, 0, 1, 1], [], []>} : vector<128x17xbf16>, vector<17x256xbf16>, vector<128x256xf32> -> vector<128x256xf32>
    %c0_3 = arith.constant 0 : index
    %c0_4 = arith.constant 0 : index
    %3 = vector.load %arg3[%c0_3, %c0_4] : memref<1x256xf32, #tpu.memory_space<vmem>>, vector<1x256xf32>
    %4 = vector.broadcast %3 : vector<1x256xf32> to vector<128x256xf32>
    %5 = arith.addf %2, %4 : vector<128x256xf32>
    %cst_5 = arith.constant 0.000000e+00 : f32
    %6 = vector.broadcast %cst_5 : f32 to vector<128x256xf32>
    %7 = arith.maximumf %5, %6 : vector<128x256xf32>
    %8 = arith.truncf %7 : vector<128x256xf32> to vector<128x256xbf16>
    %c0_6 = arith.constant 0 : index
    %c0_7 = arith.constant 0 : index
    %9 = vector.load %arg4[%c0_6, %c0_7] : memref<256x256xbf16, #tpu.memory_space<vmem>>, vector<256x256xbf16>
    %cst_8 = arith.constant dense<0.000000e+00> : vector<128x256xf32>
    %10 = tpu.matmul %8, %9, %cst_8 {dimension_numbers = #tpu.dot_dimension_numbers<[1], [0], [0], [1], [0, 0, 1, 1], [], []>} : vector<128x256xbf16>, vector<256x256xbf16>, vector<128x256xf32> -> vector<128x256xf32>
    %c0_9 = arith.constant 0 : index
    %c0_10 = arith.constant 0 : index
    %11 = vector.load %arg5[%c0_9, %c0_10] : memref<1x256xf32, #tpu.memory_space<vmem>>, vector<1x256xf32>
    %12 = vector.broadcast %11 : vector<1x256xf32> to vector<128x256xf32>
    %13 = arith.addf %10, %12 : vector<128x256xf32>
    %cst_11 = arith.constant 0.000000e+00 : f32
    %14 = vector.broadcast %cst_11 : f32 to vector<128x256xf32>
    %15 = arith.maximumf %13, %14 : vector<128x256xf32>
    %16 = arith.truncf %15 : vector<128x256xf32> to vector<128x256xbf16>
    %c0_12 = arith.constant 0 : index
    %c0_13 = arith.constant 0 : index
    %17 = vector.load %arg6[%c0_12, %c0_13] : memref<256x256xbf16, #tpu.memory_space<vmem>>, vector<256x256xbf16>
    %cst_14 = arith.constant dense<0.000000e+00> : vector<128x256xf32>
    %18 = tpu.matmul %16, %17, %cst_14 {dimension_numbers = #tpu.dot_dimension_numbers<[1], [0], [0], [1], [0, 0, 1, 1], [], []>} : vector<128x256xbf16>, vector<256x256xbf16>, vector<128x256xf32> -> vector<128x256xf32>
    %c0_15 = arith.constant 0 : index
    %c0_16 = arith.constant 0 : index
    %19 = vector.load %arg7[%c0_15, %c0_16] : memref<1x256xf32, #tpu.memory_space<vmem>>, vector<1x256xf32>
    %20 = vector.broadcast %19 : vector<1x256xf32> to vector<128x256xf32>
    %21 = arith.addf %18, %20 : vector<128x256xf32>
    %cst_17 = arith.constant 0.000000e+00 : f32
    %22 = vector.broadcast %cst_17 : f32 to vector<128x256xf32>
    %23 = arith.maximumf %21, %22 : vector<128x256xf32>
    %c0_18 = arith.constant 0 : index
    %c0_19 = arith.constant 0 : index
    %24 = vector.load %arg8[%c0_18, %c0_19] : memref<1x256xf32, #tpu.memory_space<vmem>>, vector<1x256xf32>
    %25 = vector.broadcast %24 : vector<1x256xf32> to vector<128x256xf32>
    %26 = arith.mulf %23, %25 : vector<128x256xf32>
    %cst_20 = arith.constant dense<0.000000e+00> : vector<128xf32>
    %27 = vector.multi_reduction <add>, %26, %cst_20 [1] : vector<128x256xf32> to vector<128xf32>
    %28 = vector.shape_cast %27 : vector<128xf32> to vector<128x1xf32>
    %c0_21 = arith.constant 0 : index
    %c0_22 = arith.constant 0 : index
    %29 = vector.load %arg9[%c0_21, %c0_22] : memref<1x1xf32, #tpu.memory_space<vmem>>, vector<1x1xf32>
    %30 = vector.broadcast %29 : vector<1x1xf32> to vector<128x1xf32>
    %31 = arith.addf %28, %30 : vector<128x1xf32>
    %c0_23 = arith.constant 0 : index
    %c0_24 = arith.constant 0 : index
    %32 = vector.load %arg10[%c0_23, %c0_24] : memref<128x1xf32, #tpu.memory_space<vmem>>, vector<128x1xf32>
    tpu.vector_store %arg10[%c0_23, %c0_24], %31 {strides = array<i32>} : memref<128x1xf32, #tpu.memory_space<vmem>>, vector<128x1xf32>,
    return
  }
  func.func @transform_0(%arg0: i32) -> (i32, i32) {
    %c0_i32 = arith.constant 0 : i32
    %c0_i32_0 = arith.constant 0 : i32
    return %arg0, %c0_i32 : i32, i32
  }
  func.func @transform_1(%arg0: i32) -> (i32, i32) {
    %c0_i32 = arith.constant 0 : i32
    %c0_i32_0 = arith.constant 0 : i32
    %c0_i32_1 = arith.constant 0 : i32
    return %c0_i32, %c0_i32_0 : i32, i32
  }
  func.func @transform_2(%arg0: i32) -> (i32, i32) {
    %c0_i32 = arith.constant 0 : i32
    %c0_i32_0 = arith.constant 0 : i32
    %c0_i32_1 = arith.constant 0 : i32
    return %c0_i32, %c0_i32_0 : i32, i32
  }
  func.func @transform_3(%arg0: i32) -> (i32, i32) {
    %c0_i32 = arith.constant 0 : i32
    %c0_i32_0 = arith.constant 0 : i32
    %c0_i32_1 = arith.constant 0 : i32
    return %c0_i32, %c0_i32_0 : i32, i32
  }
  func.func @transform_4(%arg0: i32) -> (i32, i32) {
    %c0_i32 = arith.constant 0 : i32
    %c0_i32_0 = arith.constant 0 : i32
    %c0_i32_1 = arith.constant 0 : i32
    return %c0_i32, %c0_i32_0 : i32, i32
  }
  func.func @transform_5(%arg0: i32) -> (i32, i32) {
    %c0_i32 = arith.constant 0 : i32
    %c0_i32_0 = arith.constant 0 : i32
    %c0_i32_1 = arith.constant 0 : i32
    return %c0_i32, %c0_i32_0 : i32, i32
  }
  func.func @transform_6(%arg0: i32) -> (i32, i32) {
    %c0_i32 = arith.constant 0 : i32
    %c0_i32_0 = arith.constant 0 : i32
    %c0_i32_1 = arith.constant 0 : i32
    return %c0_i32, %c0_i32_0 : i32, i32
  }
  func.func @transform_7(%arg0: i32) -> (i32, i32) {
    %c0_i32 = arith.constant 0 : i32
    %c0_i32_0 = arith.constant 0 : i32
    %c0_i32_1 = arith.constant 0 : i32
    return %c0_i32, %c0_i32_0 : i32, i32
  }
  func.func @transform_8(%arg0: i32) -> (i32, i32) {
    %c0_i32 = arith.constant 0 : i32
    %c0_i32_0 = arith.constant 0 : i32
    %c0_i32_1 = arith.constant 0 : i32
    return %c0_i32, %c0_i32_0 : i32, i32
  }
  func.func @transform_9(%arg0: i32) -> (i32, i32) {
    %c0_i32 = arith.constant 0 : i32
    %c0_i32_0 = arith.constant 0 : i32
    return %arg0, %c0_i32 : i32, i32
  }
}

</mosaic_0001>

<bundles_post_ra>
// kernel: critic_forward.1
= control target key start
LH: loop header
LB: loop body
LE: loop exit
PB: predicated region body
PF: predicated region fallthrough
CT: control target
= control target key end

     0   :  { %s2700_s0 = inlined_call_operand.vmem [shape: bf16[256,17], index: 0, kind: input, shape index: {}]   ;;  %s2701_s1 = inlined_call_operand.vmem [shape: bf16[17,256], index: 1, kind: input, shape index: {}]   ;;  %s2702_s2 = inlined_call_operand.vmem [shape: f32[1,256], index: 2, kind: input, shape index: {}]   ;;  %s2703_s3 = inlined_call_operand.vmem [shape: bf16[256,256], index: 3, kind: input, shape index: {}]   ;;  %s2704_s4 = inlined_call_operand.vmem [shape: f32[1,256], index: 4, kind: input, shape index: {}]   ;;  %s2705_s5 = inlined_call_operand.hbm [shape: bf16[256,256], index: 5, kind: input, shape index: {}]   ;;  %s2706_s6 = inlined_call_operand.vmem [shape: f32[1,256], index: 6, kind: input, shape index: {}]   ;;  %s2707_s7 = inlined_call_operand.vmem [shape: f32[1,256], index: 7, kind: input, shape index: {}]   ;;  %s2708_s8 = inlined_call_operand.<no memory space> [shape: f32[1,1], index: 8, kind: input, shape index: {}]   ;;  %s2709_s9 = inlined_call_operand.vmem [shape: f32[256,1], index: 9, kind: output, shape index: {}]  }
   0x1   :  { %v14_v0 = vstv %s2708_s8 }
   0x2   :  { %15 = vst [vmem:[#allocation2] sm:$0x1] %v14_v0 }
   0x3   :  { %16 = vsyncpa [#allocation4], 0  ;;  %s2208_s11 = smov 0  }
   0x4 LB: > { %s270_s14 = sshll.u32 %s2705_s5, 4  ;;  %s1675_s15 = sadd.s32 4294967295, %s2149_s11   ;;  %s2149_s11 = sphi %s2208_s11, %s22_s11   ;;  %s271_s14 = int_to_ptr.hbm [resolvable:$true] %s270_s14 }
   0x5   : > { %p1677_p0 = scmp.ge.s32.totalorder %s2149_s11, 1  ;;  %p247_p1 = scmp.lt.s32.totalorder %s2149_s11, 3 }
   0x6   : > { %p2094_p2 = scmp.eq.s32.totalorder %s1675_s15, 0  ;;  %s2151_s8 = smov [#allocation3]  }
   0x7   : > { %p248_p3 = pnand %p1677_p0, %p247_p1  ;;  %s272_s16 = sshll.u32 %s2151_s8, 4  ;;  %s273_s16 = int_to_ptr.vmem [resolvable:$true] %s272_s16 }
   0x8   : > { %s2152_s17 = smov 128   ;;  %s2153_s18 = smov 8  }
   0x9   : > { %p2090_p4 = pneg %p248_p3  ;;  %306 = sbr.rel (%p248_p3) target bundleno = 714 (0x2ca), region = 56 }
   0xb   : > { %p2091_p5 = pnand %p2094_p2, %p2090_p4 }
   0xd   : > { %2093 = dma.hbm_to_vmem [thread:$0]  (!%p2091_p5), %s271_s14, 4096, %s273_s16, [#allocation4], %s2152_s17, %s2152_s17, %s2153_s18  }
   0xe   : > { %2144 = dma.done.wait (%p2094_p2), [#allocation4], 4096  }
   0xf   : > { %2146 = vsyncadd (%p2094_p2), [#allocation4], 4294963200  ;;  %s1682_s19 = sshll.u32 %s1675_s15, 4  ;;  %vm461_vm0 = vcmask 1040384   ;;  %v374_v1 = vld [vmem:[%s2701_s1 + $0x10] sm:$0x11] }
  0x10   : > { %p344_p6 = scmp.lt.s32.totalorder %s1682_s19, 31  ;;  %v428_v2 = vunpack.c.l.b16 %v374_v1  ;;  %v429_v3 = vunpack.c.h.b16 %v374_v1  ;;  %v2154_v4 = vmov 0   ;;  %v1720_v8 = vld [vmem:[%s2701_s1] sm:$0xf]  ;;  %v2009_v9 = vld [vmem:[%s2701_s1 + $0x4] sm:$0xf0] }
  0x11   : > { %v463_v5 = vsel %vm461_vm0, 65535, %v2154_v4  ;;  %v2008_v10 = vld [vmem:[%s2701_s1 + $0x4] sm:$0xf]  ;;  %v1722_v11 = vld [vmem:[%s2701_s1 + $0x8] sm:$0xf0]  ;;  %v1721_v14 = vor.u32 %v2009_v9, %v1720_v8  ;;  %vm436_vm1 = vcmask 138240  }
  0x12   : > { %s2711_s19 = smov (!%p344_p6, %s1682_s19), 31  ;;  %v432_v6 = vpack.c.b16 %v428_v2, %v428_v2  ;;  %v433_v7 = vpack.c.b16 %v429_v3, %v429_v3  ;;  %v1725_v15 = vor.u32 %v2008_v10, %v1722_v11  ;;  %v1864_v21 = vld [vmem:[%s2703_s3 + $0xf0] sm:$0xf]  ;;  %v2041_v22 = vld [vmem:[%s2703_s3 + $0xf4] sm:$0xf0]  ;;  %vm1590_vm2 = vcmask 7168  }
  0x13   : > { %s1683_s24 = sshll.u32 %s2711_s19, 2  ;;  %v1865_v23 = vor.u32 %v2041_v22, %v1864_v21  ;;  %v2024_v24 = vld [vmem:[%s2703_s3 + $0x74] sm:$0xf]  ;;  %v1802_v25 = vld [vmem:[%s2703_s3 + $0x78] sm:$0xf0]  ;;  %s1685_s14 = sshll.u32 %s2711_s19, 3 }
  0x14   : > { %v465_v12 = vand.u32 %v463_v5, %v432_v6  ;;  %v468_v13 = vand.u32 %v463_v5, %v433_v7  ;;  %s2240_s13 = scalar_lea.vmem %s2700_s0, %s1683_s24  ;;  %v1805_v26 = vor.u32 %v2024_v24, %v1802_v25  ;;  %v1856_v27 = vld [vmem:[%s2703_s3 + $0xe0] sm:$0xf]  ;;  %v2039_v28 = vld [vmem:[%s2703_s3 + $0xe4] sm:$0xf0]  ;;  %v1800_v29 = vld [vmem:[%s2703_s3 + $0x70] sm:$0xf]  ;;  %s2640_s16 = scalar_lea.vmem %s2709_s9, %s1685_s14 }
  0x15   : > { %v2000_v16 = vld [vmem:[%s2240_s13] sm:$0xff]  ;;  %v2001_v17 = vld [vmem:[%s2240_s13 + $0x8] sm:$0xff]  ;;  %v2002_v19 = vld [vmem:[%s2240_s13 + $0x10] sm:$0xff]  ;;  %v1857_v30 = vor.u32 %v2039_v28, %v1856_v27 }
  0x16   : > { %476 = vmatpush.bf16.msra.mxu0 %v465_v12  ;;  %525 = vmatpush.bf16.msra.mxu1 %v468_v13  ;;  %v2249_v18 = vld [vmem:[%s2240_s13 + $0x20] sm:$0xff]  ;;  %v2005_v20 = vld [vmem:[%s2240_s13 + $0x28] sm:$0xff]  ;;  %v2025_v31 = vld [vmem:[%s2703_s3 + $0x74] sm:$0xf0] }
  0x17   : > { %2076 = vmatpush.bf16.msra.mxu3 %v468_v13  ;;  %2074 = vmatpush.bf16.msra.mxu2 %v465_v12  ;;  %v1848_v32 = vld [vmem:[%s2703_s3 + $0xd0] sm:$0xf]  ;;  %v1801_v33 = vor.u32 %v2025_v31, %v1800_v29  ;;  %v2037_v34 = vld [vmem:[%s2703_s3 + $0xd4] sm:$0xf0]  ;;  %v2022_v35 = vld [vmem:[%s2703_s3 + $0x64] sm:$0xf] }
  0x18   : > { %v1794_v36 = vld [vmem:[%s2703_s3 + $0x68] sm:$0xf0]  ;;  %v1792_v38 = vld [vmem:[%s2703_s3 + $0x60] sm:$0xf]  ;;  %v2023_v39 = vld [vmem:[%s2703_s3 + $0x64] sm:$0xf0]  ;;  %v1849_v43 = vor.u32 %v2037_v34, %v1848_v32 }
  0x19   : > { %v1797_v37 = vor.u32 %v2022_v35, %v1794_v36  ;;  %v1793_v40 = vor.u32 %v2023_v39, %v1792_v38  ;;  %v2040_v41 = vld [vmem:[%s2703_s3 + $0xf4] sm:$0xf]  ;;  %v1866_v42 = vld [vmem:[%s2703_s3 + $0xf8] sm:$0xf0]  ;;  %v1784_v45 = vld [vmem:[%s2703_s3 + $0x50] sm:$0xf] }
  0x1a   : > { %477 = vmatpush.bf16.msra.mxu0 %v1721_v14  ;;  %526 = vmatpush.bf16.msra.mxu1 %v1725_v15  ;;  %v1869_v44 = vor.u32 %v2040_v41, %v1866_v42  ;;  %v2021_v46 = vld [vmem:[%s2703_s3 + $0x54] sm:$0xf0]  ;;  %v2020_v47 = vld [vmem:[%s2703_s3 + $0x54] sm:$0xf]  ;;  %v1840_v48 = vld [vmem:[%s2703_s3 + $0xc0] sm:$0xf] }
  0x1b   : > { %2077 = vmatpush.bf16.msra.mxu3 %v1725_v15  ;;  %2075 = vmatpush.bf16.msra.mxu2 %v1721_v14  ;;  %v2035_v49 = vld [vmem:[%s2703_s3 + $0xc4] sm:$0xf0]  ;;  %v1786_v50 = vld [vmem:[%s2703_s3 + $0x58] sm:$0xf0]  ;;  %v2038_v52 = vld [vmem:[%s2703_s3 + $0xe4] sm:$0xf]  ;;  %v1785_v54 = vor.u32 %v2021_v46, %v1784_v45 }
  0x1c   : > { %v1789_v51 = vor.u32 %v2020_v47, %v1786_v50  ;;  %v2003_v53 = vld [vmem:[%s2240_s13 + $0x18] sm:$0xff]  ;;  %v1858_v55 = vld [vmem:[%s2703_s3 + $0xe8] sm:$0xf0]  ;;  %v2018_v56 = vld [vmem:[%s2703_s3 + $0x44] sm:$0xf]  ;;  %v1841_v58 = vor.u32 %v2035_v49, %v1840_v48 }
  0x1d   : > { %1726 = vmatmul.msk.bf16.vlgmr.msra.gmra.mxu0 %vm436_vm1, %v2000_v16  ;;  %1734 = vmatmul.msk.bf16.vlgmr.msra.gmra.mxu1 %vm436_vm1, %v2000_v16  ;;  %v1778_v57 = vld [vmem:[%s2703_s3 + $0x48] sm:$0xf0]  ;;  %v1776_v59 = vld [vmem:[%s2703_s3 + $0x40] sm:$0xf]  ;;  %v2019_v60 = vld [vmem:[%s2703_s3 + $0x44] sm:$0xf0]  ;;  %v1861_v61 = vor.u32 %v2038_v52, %v1858_v55 }
  0x1e   : > { %1738 = vmatmul.msk.bf16.vlgmr.msra.gmra.mxu3 %vm436_vm1, %v2249_v18  ;;  %1731 = vmatmul.msk.bf16.vlgmr.msra.gmra.mxu2 %vm436_vm1, %v2005_v20  ;;  %v2036_v62 = vld [vmem:[%s2703_s3 + $0xd4] sm:$0xf]  ;;  %v1832_v63 = vld [vmem:[%s2703_s3 + $0xb0] sm:$0xf]  ;;  %v2033_v0 = vld [vmem:[%s2703_s3 + $0xb4] sm:$0xf0]  ;;  %v1781_v3 = vor.u32 %v2018_v56, %v1778_v57  ;;  %v1777_v9 = vor.u32 %v2019_v60, %v1776_v59 }
  0x1f   : > { %863 = vmatpush.bf16.msrb.mxu3 %v1865_v23  ;;  %912 = vmatpush.bf16.msrb.mxu0 %v1805_v26  ;;  %v1850_v1 = vld [vmem:[%s2703_s3 + $0xd8] sm:$0xf0]  ;;  %v2006_v2 = vld [vmem:[%s2240_s13 + $0x30] sm:$0xff]  ;;  %v2034_v5 = vld [vmem:[%s2703_s3 + $0xc4] sm:$0xf]  ;;  %v1833_v10 = vor.u32 %v2033_v0, %v1832_v63 }
  0x20   : > { %814 = vmatpush.bf16.msrb.mxu2 %v1801_v33  ;;  %961 = vmatpush.bf16.msrb.mxu1 %v1869_v44  ;;  %v1853_v4 = vor.u32 %v2036_v62, %v1850_v1  ;;  %v1842_v6 = vld [vmem:[%s2703_s3 + $0xc8] sm:$0xf0]  ;;  %v2016_v7 = vld [vmem:[%s2703_s3 + $0x34] sm:$0xf]  ;;  %v1770_v8 = vld [vmem:[%s2703_s3 + $0x38] sm:$0xf0] }
  0x21   : > { %v1768_v11 = vld [vmem:[%s2703_s3 + $0x30] sm:$0xf]  ;;  %v2017_v12 = vld [vmem:[%s2703_s3 + $0x34] sm:$0xf0]  ;;  %v1824_v13 = vld [vmem:[%s2703_s3 + $0xa0] sm:$0xf]  ;;  %v1845_v15 = vor.u32 %v2034_v5, %v1842_v6  ;;  %v1773_v16 = vor.u32 %v2016_v7, %v1770_v8 }
  0x22   : > { %v2031_v14 = vld [vmem:[%s2703_s3 + $0xa4] sm:$0xf0]  ;;  %v2007_v23 = vld [vmem:[%s2240_s13 + $0x38] sm:$0xff]  ;;  %v2032_v24 = vld [vmem:[%s2703_s3 + $0xb4] sm:$0xf] }
  0x23   : > { %864 = vmatpush.bf16.msrb.mxu3 %v1857_v30  ;;  %913 = vmatpush.bf16.msrb.mxu0 %v1797_v37  ;;  %v2015_v21 = vld [vmem:[%s2703_s3 + $0x24] sm:$0xf0]  ;;  %v1834_v25 = vld [vmem:[%s2703_s3 + $0xb8] sm:$0xf0]  ;;  %v2014_v27 = vld [vmem:[%s2703_s3 + $0x24] sm:$0xf] }
  0x24   : > { %815 = vmatpush.bf16.msrb.mxu2 %v1793_v40  ;;  %962 = vmatpush.bf16.msrb.mxu1 %v1861_v61  ;;  %v1837_v26 = vor.u32 %v2032_v24, %v1834_v25  ;;  %v2030_v29 = vld [vmem:[%s2703_s3 + $0xa4] sm:$0xf]  ;;  %v1826_v30 = vld [vmem:[%s2703_s3 + $0xa8] sm:$0xf0]  ;;  %v1816_v31 = vld [vmem:[%s2703_s3 + $0x90] sm:$0xf] }
  0x25   : > { %v2029_v32 = vld [vmem:[%s2703_s3 + $0x94] sm:$0xf0]  ;;  %v1752_v33 = vld [vmem:[%s2703_s3 + $0x10] sm:$0xf]  ;;  %v1829_v34 = vor.u32 %v2030_v29, %v1826_v30  ;;  %v2012_v38 = vld [vmem:[%s2703_s3 + $0x14] sm:$0xf] }
  0x26   : > { %v1817_v35 = vor.u32 %v2029_v32, %v1816_v31  ;;  %v2013_v36 = vld [vmem:[%s2703_s3 + $0x14] sm:$0xf0]  ;;  %v1754_v39 = vld [vmem:[%s2703_s3 + $0x18] sm:$0xf0]  ;;  %v2028_v40 = vld [vmem:[%s2703_s3 + $0x94] sm:$0xf] }
  0x27   : > { %865 = vmatpush.bf16.msrb.mxu3 %v1849_v43  ;;  %914 = vmatpush.bf16.msrb.mxu0 %v1789_v51  ;;  %v1753_v37 = vor.u32 %v2013_v36, %v1752_v33  ;;  %v1757_v41 = vor.u32 %v2012_v38, %v1754_v39  ;;  %v1818_v42 = vld [vmem:[%s2703_s3 + $0x98] sm:$0xf0]  ;;  %v1744_v44 = vld [vmem:[%s2703_s3] sm:$0xf]  ;;  %v2011_v45 = vld [vmem:[%s2703_s3 + $0x4] sm:$0xf0] }
  0x28   : > { %816 = vmatpush.bf16.msrb.mxu2 %v1785_v54  ;;  %963 = vmatpush.bf16.msrb.mxu1 %v1853_v4  ;;  %v1821_v43 = vor.u32 %v2028_v40, %v1818_v42  ;;  %v1808_v46 = vld [vmem:[%s2703_s3 + $0x80] sm:$0xf]  ;;  %v1745_v47 = vor.u32 %v2011_v45, %v1744_v44  ;;  %v2027_v48 = vld [vmem:[%s2703_s3 + $0x84] sm:$0xf0]  ;;  %v2010_v49 = vld [vmem:[%s2703_s3 + $0x4] sm:$0xf] }
  0x29   : > { %v1746_v50 = vld [vmem:[%s2703_s3 + $0x8] sm:$0xf0]  ;;  %v1809_v51 = vor.u32 %v2027_v48, %v1808_v46  ;;  %v375_v56 = vld [vmem:[%s2702_s2] sm:$0x3]  ;;  %v1928_v61 = vld [vmem:[#allocation3 + $0x70] sm:$0xf] }
  0x2a   : > { %v1749_v52 = vor.u32 %v2010_v49, %v1746_v50  ;;  %v1810_v54 = vld [vmem:[%s2703_s3 + $0x88] sm:$0xf0]  ;;  %v2465_v59 = vperm.slane %v375_v56, 0  ;;  %v2467_v60 = vperm.slane %v375_v56, 1  ;;  %v2057_v62 = vld [vmem:[#allocation3 + $0x74] sm:$0xf0] }
  0x2b   : > { %866 = vmatpush.bf16.msrb.mxu3 %v1841_v58  ;;  %915 = vmatpush.bf16.msrb.mxu0 %v1781_v3  ;;  %v1929_v63 = vor.u32 %v2057_v62, %v1928_v61  ;;  %v2072_v30 = vld [vmem:[#allocation3 + $0xf4] sm:$0xf]  ;;  %v1994_v31 = vld [vmem:[#allocation3 + $0xf8] sm:$0xf0]  ;;  %v2053_v38 = vld [vmem:[#allocation3 + $0x54] sm:$0xf0] }
  0x2c   : > { %817 = vmatpush.bf16.msrb.mxu2 %v1777_v9  ;;  %964 = vmatpush.bf16.msrb.mxu1 %v1845_v15  ;;  %v2055_v15 = vld [vmem:[#allocation3 + $0x64] sm:$0xf0]  ;;  %v1997_v32 = vor.u32 %v2072_v30, %v1994_v31  ;;  %v1984_v40 = vld [vmem:[#allocation3 + $0xe0] sm:$0xf]  ;;  %v1896_v30 = vld [vmem:[#allocation3 + $0x30] sm:$0xf] }
  0x2d   : > { %1727 = vmatmul.msk.bf16.gmra.mxu0 %vm436_vm1, %v2001_v17  ;;  %1735 = vmatmul.msk.bf16.gmra.mxu1 %vm436_vm1, %v2001_v17  ;;  %v1769_v17 = vor.u32 %v2017_v12, %v1768_v11  ;;  %v2049_v31 = vld [vmem:[#allocation3 + $0x34] sm:$0xf0] }
  0x2e   : > { %1739 = vmatmul.msk.bf16.gmra.mxu3 %vm436_vm1, %v2005_v20  ;;  %1732 = vmatmul.msk.bf16.gmra.mxu2 %vm436_vm1, %v2006_v2  ;;  %v1760_v20 = vld [vmem:[%s2703_s3 + $0x20] sm:$0xf] }
  0x2f   : > { %867 = vmatpush.bf16.msrb.mxu3 %v1833_v10  ;;  %916 = vmatpush.bf16.msrb.mxu0 %v1773_v16  ;;  %v1761_v22 = vor.u32 %v2015_v21, %v1760_v20 }
  0x30   : > { %818 = vmatpush.bf16.msrb.mxu2 %v1769_v17  ;;  %965 = vmatpush.bf16.msrb.mxu1 %v1837_v26  ;;  %v1992_v17 = vld [vmem:[#allocation3 + $0xf0] sm:$0xf] }
  0x34   : > { %819 = vmatpush.bf16.msrb.mxu2 %v1761_v22  ;;  %966 = vmatpush.bf16.msrb.mxu1 %v1829_v34 }
  0x38   : > { %820 = vmatpush.bf16.msrb.mxu2 %v1753_v37  ;;  %967 = vmatpush.bf16.msrb.mxu1 %v1821_v43  ;;  %v1912_v37 = vld [vmem:[#allocation3 + $0x50] sm:$0xf] }
  0x39   : > { %v1913_v39 = vor.u32 %v2053_v38, %v1912_v37 }
  0x3c   : > { %821 = vmatpush.bf16.msrb.mxu2 %v1745_v47 }
  0x3d   : > { %1728 = vmatmul.msk.bf16.gmra.mxu0 %vm436_vm1, %v2002_v19  ;;  %1736 = vmatmul.msk.bf16.gmra.mxu1 %vm436_vm1, %v2002_v19  ;;  %v1825_v19 = vor.u32 %v2031_v14, %v1824_v13  ;;  %v1920_v14 = vld [vmem:[#allocation3 + $0x60] sm:$0xf] }
  0x3e   : > { %1740 = vmatmul.msk.bf16.gmra.mxu3 %vm436_vm1, %v2006_v2  ;;  %1733 = vmatmul.msk.bf16.gmra.mxu2 %vm436_vm1, %v2007_v23  ;;  %v1921_v16 = vor.u32 %v2055_v15, %v1920_v14 }
  0x3f   : > { %868 = vmatpush.bf16.msrb.mxu3 %v1825_v19  ;;  %v2073_v19 = vld [vmem:[#allocation3 + $0xf4] sm:$0xf0] }
  0x40   : > { %1256 = vmatpush.bf16.msra.mxu2 %v1929_v63  ;;  %v1993_v20 = vor.u32 %v2073_v19, %v1992_v17 }
  0x43   : > { %869 = vmatpush.bf16.msrb.mxu3 %v1817_v35 }
  0x44   : > { %1257 = vmatpush.bf16.msra.mxu2 %v1921_v16 }
  0x47   : > { %870 = vmatpush.bf16.msrb.mxu3 %v1809_v51 }
  0x48   : > { %1258 = vmatpush.bf16.msra.mxu2 %v1913_v39  ;;  %v2066_v39 = vld [vmem:[#allocation3 + $0xc4] sm:$0xf] }
  0x4b   : > { %1305 = vmatpush.bf16.msra.mxu3 %v1993_v20 }
  0x4d   : > { %1729 = vmatmul.msk.bf16.gmra.mxu0 %vm436_vm1, %v2003_v53  ;;  %1737 = vmatmul.msk.bf16.gmra.mxu1 %vm436_vm1, %v2003_v53  ;;  %v2026_v53 = vld [vmem:[%s2703_s3 + $0x84] sm:$0xf] }
  0x4e   : > { %1741 = vmatmul.msk.bf16.gmra.mxu3 %vm436_vm1, %v2007_v23  ;;  %v1813_v55 = vor.u32 %v2026_v53, %v1810_v54  ;;  %v2056_v53 = vld [vmem:[#allocation3 + $0x74] sm:$0xf]  ;;  %v1930_v54 = vld [vmem:[#allocation3 + $0x78] sm:$0xf0] }
  0x4f   : > { %v2483_v56 = vor.u32 %v2056_v53, %v1930_v54 }
  0x50   : > { %968 = vmatpush.bf16.msrb.mxu1 %v1813_v55 }
  0x54   : > { %1403 = vmatpush.bf16.msra.mxu1 %v1997_v32  ;;  %v1968_v32 = vld [vmem:[#allocation3 + $0xc0] sm:$0xf] }
  0x5d   : > { %1730 = vmatmul.msk.bf16.gmra.mxu0 %vm436_vm1, %v2249_v18  ;;  %v1762_v18 = vld [vmem:[%s2703_s3 + $0x28] sm:$0xf0] }
  0x5e   : > { %v1765_v28 = vor.u32 %v2014_v27, %v1762_v18 }
  0x60   : > { %917 = vmatpush.bf16.msrb.mxu0 %v1765_v28 }
  0x64   : > { %918 = vmatpush.bf16.msrb.mxu0 %v1757_v41  ;;  %v2071_v41 = vld [vmem:[#allocation3 + $0xe4] sm:$0xf0] }
  0x65   : > { %v1985_v42 = vor.u32 %v2071_v41, %v1984_v40  ;;  %v1970_v40 = vld [vmem:[#allocation3 + $0xc8] sm:$0xf0] }
  0x66   : > { %v1973_v41 = vor.u32 %v2066_v39, %v1970_v40 }
  0x67   : > { %1306 = vmatpush.bf16.msra.mxu3 %v1985_v42 }
  0x68   : > { %919 = vmatpush.bf16.msrb.mxu0 %v1749_v52 }
  0x6c   : > { %1354 = vmatpush.bf16.msra.mxu0 %v2483_v56 }
  0x9a   : > { %v479_v57 = vpop.f32.mrf.mxu0  ;;  %v528_v58 = vpop.f32.mrf.mxu1 }
  0x9b   : > { %v480_v0 = vadd.f32 %v479_v57, %v2465_v59  ;;  %v529_v1 = vadd.f32 %v528_v58, %v2467_v60  ;;  %v2070_v57 = vld [vmem:[#allocation3 + $0xe4] sm:$0xf]  ;;  %v1986_v58 = vld [vmem:[#allocation3 + $0xe8] sm:$0xf0] }
  0x9c   : > { %v1989_v63 = vor.u32 %v2070_v57, %v1986_v58  ;;  %v2047_v57 = vld [vmem:[#allocation3 + $0x24] sm:$0xf0]  ;;  %v1960_v58 = vld [vmem:[#allocation3 + $0xb0] sm:$0xf] }
  0x9d   : > { %v568_v6 = vmax.f32 %v480_v0, 0.0  ;;  %v569_v7 = vmax.f32 %v529_v1, 0.0 }
  0x9e   : > { %1404 = vmatpush.bf16.msra.mxu1 %v1989_v63  ;;  %v2050_v63 = vld [vmem:[#allocation3 + $0x44] sm:$0xf] }
  0xa1   : > { %v2481_v55 = vpop.f32.mrf.mxu3 }
  0xa2   : > { %v481_v2 = vpop.f32.mrf.mxu0  ;;  %v530_v3 = vpop.f32.mrf.mxu1  ;;  %v549_v42 = vadd.f32 %v2481_v55, %v2467_v60  ;;  %v1888_v55 = vld [vmem:[#allocation3 + $0x20] sm:$0xf] }
  0xa3   : > { %v482_v4 = vadd.f32 %v481_v2, %v2465_v59  ;;  %v531_v5 = vadd.f32 %v530_v3, %v2467_v60  ;;  %v1904_v2 = vld [vmem:[#allocation3 + $0x40] sm:$0xf]  ;;  %v2051_v3 = vld [vmem:[#allocation3 + $0x44] sm:$0xf0] }
  0xa5   : > { %v570_v8 = vmax.f32 %v482_v4, 0.0  ;;  %v571_v9 = vmax.f32 %v531_v5, 0.0  ;;  %v1976_v4 = vld [vmem:[#allocation3 + $0xd0] sm:$0xf]  ;;  %v1905_v5 = vor.u32 %v2051_v3, %v1904_v2  ;;  %v2064_v3 = vld [vmem:[#allocation3 + $0xb4] sm:$0xf] }
  0xa7   : > { %v600_v10 = vpack.c.bf16 %v570_v8, %v568_v6  ;;  %v601_v11 = vpack.c.bf16 %v571_v9, %v569_v7  ;;  %v2069_v6 = vld [vmem:[#allocation3 + $0xd4] sm:$0xf0]  ;;  %v2054_v7 = vld [vmem:[#allocation3 + $0x64] sm:$0xf]  ;;  %v1922_v8 = vld [vmem:[#allocation3 + $0x68] sm:$0xf0]  ;;  %1259 = vmatpush.bf16.msra.mxu2 %v1905_v5 }
  0xa8   : > { %v1977_v9 = vor.u32 %v2069_v6, %v1976_v4  ;;  %v1962_v4 = vld [vmem:[#allocation3 + $0xb8] sm:$0xf0] }
  0xa9   : > { %822 = vmatmul.bf16.vlgmr.msrb.gmra.mxu2 %v600_v10  ;;  %871 = vmatmul.bf16.vlgmr.msrb.gmra.mxu3 %v601_v11  ;;  %v550_v14 = vpop.f32.mrf.mxu3  ;;  %v1965_v5 = vor.u32 %v2064_v3, %v1962_v4 }
  0xaa   : > { %920 = vmatmul.bf16.vlgmr.msrb.gmra.mxu0 %v600_v10  ;;  %969 = vmatmul.bf16.vlgmr.msrb.gmra.mxu1 %v601_v11  ;;  %v484_v12 = vpop.f32.mrf.mxu0  ;;  %v533_v13 = vpop.f32.mrf.mxu1  ;;  %v2486_v10 = vor.u32 %v2054_v7, %v1922_v8  ;;  %v2068_v11 = vld [vmem:[#allocation3 + $0xd4] sm:$0xf] }
  0xab   : > { %v485_v21 = vadd.f32 %v484_v12, %v2465_v59  ;;  %v534_v22 = vadd.f32 %v533_v13, %v2467_v60  ;;  %v1978_v12 = vld [vmem:[#allocation3 + $0xd8] sm:$0xf0]  ;;  %1307 = vmatpush.bf16.msra.mxu3 %v1977_v9 }
  0xac   : > { %v1981_v13 = vor.u32 %v2068_v11, %v1978_v12  ;;  %1355 = vmatpush.bf16.msra.mxu0 %v2486_v10 }
  0xad   : > { %v572_v27 = vmax.f32 %v485_v21, 0.0  ;;  %v573_v18 = vmax.f32 %v534_v22, 0.0 }
  0xae   : > { %1405 = vmatpush.bf16.msra.mxu1 %v1981_v13 }
  0xb2   : > { %v486_v23 = vpop.f32.mrf.mxu0  ;;  %v535_v24 = vpop.f32.mrf.mxu1  ;;  %1406 = vmatpush.bf16.msra.mxu1 %v1973_v41 }
  0xb3   : > { %v487_v25 = vadd.f32 %v486_v23, %v2465_v59  ;;  %v536_v26 = vadd.f32 %v535_v24, %v2467_v60 }
  0xb5   : > { %v574_v28 = vmax.f32 %v487_v25, 0.0  ;;  %v575_v29 = vmax.f32 %v536_v26, 0.0 }
  0xb6   : > { %1407 = vmatpush.bf16.msra.mxu1 %v1965_v5  ;;  %v1936_v5 = vld [vmem:[#allocation3 + $0x80] sm:$0xf] }
  0xb7   : > { %v602_v33 = vpack.c.bf16 %v574_v28, %v572_v27  ;;  %v603_v34 = vpack.c.bf16 %v575_v29, %v573_v18  ;;  %v504_v18 = vpop.f32.mrf.mxu2  ;;  %v553_v29 = vpop.f32.mrf.mxu3 }
  0xb8   : > { %v505_v8 = vadd.f32 %v504_v18, %v2465_v59  ;;  %v554_v9 = vadd.f32 %v553_v29, %v2467_v60  ;;  %v1898_v18 = vld [vmem:[#allocation3 + $0x38] sm:$0xf0] }
  0xb9   : > { %827 = vmatmul.bf16.gmra.mxu2 %v602_v33  ;;  %876 = vmatmul.bf16.gmra.mxu3 %v603_v34 }
  0xba   : > { %925 = vmatmul.bf16.gmra.mxu0 %v602_v33  ;;  %974 = vmatmul.bf16.gmra.mxu1 %v603_v34  ;;  %v489_v35 = vpop.f32.mrf.mxu0  ;;  %v538_v36 = vpop.f32.mrf.mxu1  ;;  %v1897_v33 = vor.u32 %v2049_v31, %v1896_v30  ;;  %v2067_v34 = vld [vmem:[#allocation3 + $0xc4] sm:$0xf0]  ;;  %v588_v13 = vmax.f32 %v505_v8, 0.0  ;;  %v2062_v30 = vld [vmem:[#allocation3 + $0xa4] sm:$0xf] }
  0xbb   : > { %v490_v43 = vadd.f32 %v489_v35, %v2465_v59  ;;  %v539_v44 = vadd.f32 %v538_v36, %v2467_v60  ;;  %v2052_v35 = vld [vmem:[#allocation3 + $0x54] sm:$0xf]  ;;  %v1914_v36 = vld [vmem:[#allocation3 + $0x58] sm:$0xf0]  ;;  %v1969_v37 = vor.u32 %v2067_v34, %v1968_v32  ;;  %v1954_v31 = vld [vmem:[#allocation3 + $0xa8] sm:$0xf0] }
  0xbc   : > { %v2493_v38 = vor.u32 %v2052_v35, %v1914_v36  ;;  %1260 = vmatpush.bf16.msra.mxu2 %v1897_v33  ;;  %v1957_v32 = vor.u32 %v2062_v30, %v1954_v31 }
  0xbd   : > { %v576_v49 = vmax.f32 %v490_v43, 0.0  ;;  %v577_v50 = vmax.f32 %v539_v44, 0.0  ;;  %1308 = vmatpush.bf16.msra.mxu3 %v1969_v37  ;;  %v551_v43 = vadd.f32 %v550_v14, %v2467_v60  ;;  %v589_v14 = vmax.f32 %v554_v9, 0.0 }
  0xbe   : > { %1356 = vmatpush.bf16.msra.mxu0 %v2493_v38  ;;  %1408 = vmatpush.bf16.msra.mxu1 %v1957_v32 }
  0xc2   : > { %v491_v45 = vpop.f32.mrf.mxu0  ;;  %v540_v46 = vpop.f32.mrf.mxu1 }
  0xc3   : > { %v492_v47 = vadd.f32 %v491_v45, %v2465_v59  ;;  %v541_v48 = vadd.f32 %v540_v46, %v2467_v60  ;;  %v585_v46 = vmax.f32 %v549_v42, 0.0 }
  0xc5   : > { %v578_v51 = vmax.f32 %v492_v47, 0.0  ;;  %v579_v52 = vmax.f32 %v541_v48, 0.0  ;;  %v587_v47 = vmax.f32 %v551_v43, 0.0 }
  0xc7   : > { %v604_v61 = vpack.c.bf16 %v578_v51, %v576_v49  ;;  %v605_v62 = vpack.c.bf16 %v579_v52, %v577_v50  ;;  %v506_v49 = vpop.f32.mrf.mxu2  ;;  %v555_v50 = vpop.f32.mrf.mxu3  ;;  %v609_v54 = vpack.c.bf16 %v587_v47, %v585_v46 }
  0xc8   : > { %v507_v11 = vadd.f32 %v506_v49, %v2465_v59  ;;  %v556_v12 = vadd.f32 %v555_v50, %v2467_v60  ;;  %v1944_v49 = vld [vmem:[#allocation3 + $0x90] sm:$0xf]  ;;  %v2061_v50 = vld [vmem:[#allocation3 + $0x94] sm:$0xf0] }
  0xc9   : > { %832 = vmatmul.bf16.gmra.mxu2 %v604_v61  ;;  %881 = vmatmul.bf16.gmra.mxu3 %v605_v62 }
  0xca   : > { %930 = vmatmul.bf16.gmra.mxu0 %v604_v61  ;;  %979 = vmatmul.bf16.gmra.mxu1 %v605_v62  ;;  %v494_v0 = vpop.f32.mrf.mxu0  ;;  %v543_v1 = vpop.f32.mrf.mxu1  ;;  %v1889_v61 = vor.u32 %v2047_v57, %v1888_v55  ;;  %v2065_v62 = vld [vmem:[#allocation3 + $0xb4] sm:$0xf0]  ;;  %v1945_v55 = vor.u32 %v2061_v50, %v1944_v49  ;;  %v1946_v57 = vld [vmem:[#allocation3 + $0x98] sm:$0xf0] }
  0xcb   : > { %v495_v15 = vadd.f32 %v494_v0, %v2465_v59  ;;  %v544_v16 = vadd.f32 %v543_v1, %v2467_v60  ;;  %v1906_v0 = vld [vmem:[#allocation3 + $0x48] sm:$0xf0]  ;;  %v1961_v1 = vor.u32 %v2065_v62, %v1960_v58 }
  0xcc   : > { %v2501_v2 = vor.u32 %v2050_v63, %v1906_v0  ;;  %1261 = vmatpush.bf16.msra.mxu2 %v1889_v61  ;;  %v2046_v61 = vld [vmem:[#allocation3 + $0x24] sm:$0xf]  ;;  %v1890_v62 = vld [vmem:[#allocation3 + $0x28] sm:$0xf0]  ;;  %v1872_v0 = vld [vmem:[#allocation3] sm:$0xf] }
  0xcd   : > { %v580_v22 = vmax.f32 %v495_v15, 0.0  ;;  %v581_v23 = vmax.f32 %v544_v16, 0.0  ;;  %1309 = vmatpush.bf16.msra.mxu3 %v1961_v1  ;;  %v590_v15 = vmax.f32 %v507_v11, 0.0  ;;  %v591_v16 = vmax.f32 %v556_v12, 0.0  ;;  %v2043_v1 = vld [vmem:[#allocation3 + $0x4] sm:$0xf0] }
  0xce   : > { %1357 = vmatpush.bf16.msra.mxu0 %v2501_v2  ;;  %v1893_v3 = vor.u32 %v2046_v61, %v1890_v62  ;;  %v1873_v4 = vor.u32 %v2043_v1, %v1872_v0  ;;  %v1938_v11 = vld [vmem:[#allocation3 + $0x88] sm:$0xf0] }
  0xcf   : > { %v509_v6 = vpop.f32.mrf.mxu2  ;;  %v558_v7 = vpop.f32.mrf.mxu3 }
  0xd0   : > { %v510_v33 = vadd.f32 %v509_v6, %v2465_v59  ;;  %v559_v34 = vadd.f32 %v558_v7, %v2467_v60  ;;  %v2059_v6 = vld [vmem:[#allocation3 + $0x84] sm:$0xf0]  ;;  %v2058_v7 = vld [vmem:[#allocation3 + $0x84] sm:$0xf] }
  0xd1   : > { %v1941_v12 = vor.u32 %v2058_v7, %v1938_v11 }
  0xd2   : > { %v496_v17 = vpop.f32.mrf.mxu0  ;;  %v545_v19 = vpop.f32.mrf.mxu1  ;;  %v592_v40 = vmax.f32 %v510_v33, 0.0  ;;  %v593_v41 = vmax.f32 %v559_v34, 0.0 }
  0xd3   : > { %v497_v20 = vadd.f32 %v496_v17, %v2465_v59  ;;  %v546_v21 = vadd.f32 %v545_v19, %v2467_v60  ;;  %v610_v17 = vpack.c.bf16 %v590_v15, %v588_v13  ;;  %v611_v19 = vpack.c.bf16 %v591_v16, %v589_v14  ;;  %v2044_v13 = vld [vmem:[#allocation3 + $0x14] sm:$0xf]  ;;  %v1882_v14 = vld [vmem:[#allocation3 + $0x18] sm:$0xf0] }
  0xd4   : > { %v1885_v15 = vor.u32 %v2044_v13, %v1882_v14 }
  0xd5   : > { %v582_v24 = vmax.f32 %v497_v20, 0.0  ;;  %v583_v25 = vmax.f32 %v546_v21, 0.0 }
  0xd7   : > { %v606_v26 = vpack.c.bf16 %v582_v24, %v580_v22  ;;  %v607_v27 = vpack.c.bf16 %v583_v25, %v581_v23  ;;  %v511_v20 = vpop.f32.mrf.mxu2  ;;  %v560_v21 = vpop.f32.mrf.mxu3  ;;  %v1880_v22 = vld [vmem:[#allocation3 + $0x10] sm:$0xf]  ;;  %v2045_v23 = vld [vmem:[#allocation3 + $0x14] sm:$0xf0]  ;;  %v1952_v24 = vld [vmem:[#allocation3 + $0xa0] sm:$0xf] }
  0xd8   : > { %v1881_v25 = vor.u32 %v2045_v23, %v1880_v22  ;;  %v512_v35 = vadd.f32 %v511_v20, %v2465_v59  ;;  %v561_v36 = vadd.f32 %v560_v21, %v2467_v60  ;;  %v1874_v20 = vld [vmem:[#allocation3 + $0x8] sm:$0xf0] }
  0xd9   : > { %837 = vmatmul.bf16.gmra.mxu2 %v606_v26  ;;  %886 = vmatmul.bf16.gmra.mxu3 %v607_v27 }
  0xda   : > { %935 = vmatmul.bf16.gmra.mxu0 %v606_v26  ;;  %984 = vmatmul.bf16.gmra.mxu1 %v607_v27  ;;  %v499_v28 = vpop.f32.mrf.mxu0  ;;  %v2063_v26 = vld [vmem:[#allocation3 + $0xa4] sm:$0xf0]  ;;  %v2048_v27 = vld [vmem:[#allocation3 + $0x34] sm:$0xf]  ;;  %v594_v42 = vmax.f32 %v512_v35, 0.0  ;;  %v595_v43 = vmax.f32 %v561_v36, 0.0 }
  0xdb   : > { %v500_v44 = vadd.f32 %v499_v28, %v2465_v59  ;;  %v1953_v28 = vor.u32 %v2063_v26, %v1952_v24  ;;  %v2508_v29 = vor.u32 %v2048_v27, %v1898_v18  ;;  %1262 = vmatpush.bf16.msra.mxu2 %v1881_v25 }
  0xdd   : > { %v584_v51 = vmax.f32 %v500_v44, 0.0  ;;  %1310 = vmatpush.bf16.msra.mxu3 %v1953_v28  ;;  %1358 = vmatpush.bf16.msra.mxu0 %v2508_v29  ;;  %v612_v44 = vpack.c.bf16 %v594_v42, %v592_v40 }
  0xdf   : > { %v514_v37 = vpop.f32.mrf.mxu2  ;;  %v563_v39 = vpop.f32.mrf.mxu3  ;;  %1263 = vmatpush.bf16.msra.mxu2 %v1873_v4 }
  0xe1   : > { %1311 = vmatpush.bf16.msra.mxu3 %v1945_v55  ;;  %1359 = vmatpush.bf16.msra.mxu0 %v1893_v3 }
  0xe2   : > { %v501_v45 = vpop.f32.mrf.mxu0 }
  0xe3   : > { %v502_v48 = vadd.f32 %v501_v45, %v2465_v59  ;;  %v613_v45 = vpack.c.bf16 %v595_v43, %v593_v41  ;;  %2078 = vmatpush.bf16.msrb.mxu2 %v2483_v56  ;;  %v648_v56 = vld [vmem:[%s2704_s4] sm:$0x3] }
  0xe4   : > { %v2527_v24 = vperm.slane %v648_v56, 1 }
  0xe5   : > { %v586_v52 = vmax.f32 %v502_v48, 0.0  ;;  %v515_v48 = vadd.f32 %v514_v37, %v2465_v59  ;;  %1360 = vmatpush.bf16.msra.mxu0 %v1885_v15 }
  0xe7   : > { %v608_v53 = vpack.c.bf16 %v586_v52, %v584_v51  ;;  %v516_v46 = vpop.f32.mrf.mxu2  ;;  %v565_v47 = vpop.f32.mrf.mxu3  ;;  %v2060_v51 = vld [vmem:[#allocation3 + $0x94] sm:$0xf]  ;;  %v564_v52 = vadd.f32 %v563_v39, %v2467_v60  ;;  %v596_v63 = vmax.f32 %v515_v48, 0.0  ;;  %2079 = vmatpush.bf16.msrb.mxu2 %v2486_v10  ;;  %v2530_v10 = vperm.slane %v648_v56, 0 }
  0xe8   : > { %v1949_v58 = vor.u32 %v2060_v51, %v1946_v57 }
  0xe9   : > { %842 = vmatmul.bf16.gmra.mxu2 %v608_v53  ;;  %891 = vmatmul.bf16.gmra.mxu3 %v609_v54  ;;  %v597_v8 = vmax.f32 %v564_v52, 0.0 }
  0xea   : > { %940 = vmatmul.bf16.gmra.mxu0 %v608_v53  ;;  %989 = vmatmul.bf16.gmra.mxu1 %v609_v54  ;;  %v517_v53 = vadd.f32 %v516_v46, %v2465_v59  ;;  %v566_v54 = vadd.f32 %v565_v47, %v2467_v60  ;;  %v1937_v60 = vor.u32 %v2059_v6, %v1936_v5 }
  0xeb   : > { %1409 = vmatpush.bf16.msra.mxu1 %v1949_v58  ;;  %2080 = vmatpush.bf16.msrb.mxu2 %v2493_v38 }
  0xec   : > { %v598_v9 = vmax.f32 %v517_v53, 0.0  ;;  %v599_v59 = vmax.f32 %v566_v54, 0.0  ;;  %1312 = vmatpush.bf16.msra.mxu3 %v1937_v60 }
  0xee   : > { %v614_v16 = vpack.c.bf16 %v598_v9, %v596_v63 }
  0xef   : > { %1410 = vmatpush.bf16.msra.mxu1 %v1941_v12  ;;  %2081 = vmatpush.bf16.msrb.mxu2 %v2501_v2 }
  0xf3   : > { %2082 = vmatpush.bf16.msrb.mxu2 %v2508_v29 }
  0xf7   : > { %2083 = vmatpush.bf16.msrb.mxu2 %v1893_v3 }
  0xf9   : > { %847 = vmatmul.bf16.gmra.mxu2 %v610_v17  ;;  %896 = vmatmul.bf16.gmra.mxu3 %v611_v19 }
  0xfa   : > { %945 = vmatmul.bf16.gmra.mxu0 %v610_v17  ;;  %994 = vmatmul.bf16.gmra.mxu1 %v611_v19  ;;  %v615_v17 = vpack.c.bf16 %v599_v59, %v597_v8  ;;  %v2042_v19 = vld [vmem:[#allocation3 + $0x4] sm:$0xf] }
  0xfb   : > { %v1877_v21 = vor.u32 %v2042_v19, %v1874_v20  ;;  %2084 = vmatpush.bf16.msrb.mxu2 %v1885_v15 }
  0xfd   : > { %1361 = vmatpush.bf16.msra.mxu0 %v1877_v21 }
  0xff   : > { %2085 = vmatpush.bf16.msrb.mxu2 %v1877_v21 }
 0x109   : > { %852 = vmatmul.bf16.gmra.mxu2 %v612_v44  ;;  %901 = vmatmul.bf16.gmra.mxu3 %v613_v45 }
 0x10a   : > { %950 = vmatmul.bf16.gmra.mxu0 %v612_v44  ;;  %999 = vmatmul.bf16.gmra.mxu1 %v613_v45 }
 0x119   : > { %857 = vmatmul.bf16.gmra.mxu2 %v614_v16  ;;  %906 = vmatmul.bf16.gmra.mxu3 %v615_v17 }
 0x11a   : > { %955 = vmatmul.bf16.gmra.mxu0 %v614_v16  ;;  %1004 = vmatmul.bf16.gmra.mxu1 %v615_v17 }
 0x127   : > { %v921_v22 = vpop.f32.mrf.mxu0  ;;  %v970_v23 = vpop.f32.mrf.mxu1 }
 0x128   : > { %v922_v25 = vadd.f32 %v921_v22, %v2527_v24 }
 0x12a   : > { %v971_v2 = vadd.f32 %v970_v23, %v922_v25 }
 0x12c   : > { %v823_v26 = vpop.f32.mrf.mxu2  ;;  %v872_v27 = vpop.f32.mrf.mxu3  ;;  %v1011_v29 = vmax.f32 %v971_v2, 0.0 }
 0x12d   : > { %v824_v30 = vadd.f32 %v823_v26, %v2530_v10 }
 0x12f   : > { %v923_v38 = vpop.f32.mrf.mxu0  ;;  %v972_v18 = vpop.f32.mrf.mxu1  ;;  %v873_v35 = vadd.f32 %v872_v27, %v824_v30 }
 0x130   : > { %v924_v28 = vadd.f32 %v923_v38, %v2527_v24 }
 0x131   : > { %v1010_v42 = vmax.f32 %v873_v35, 0.0 }
 0x132   : > { %v973_v31 = vadd.f32 %v972_v18, %v924_v28 }
 0x134   : > { %v1013_v32 = vmax.f32 %v973_v31, 0.0  ;;  %v825_v33 = vpop.f32.mrf.mxu2  ;;  %v874_v34 = vpop.f32.mrf.mxu3 }
 0x135   : > { %v826_v36 = vadd.f32 %v825_v33, %v2530_v10 }
 0x136   : > { %v1043_v37 = vpack.c.bf16 %v1013_v32, %v1011_v29 }
 0x137   : > { %v875_v39 = vadd.f32 %v874_v34, %v826_v36  ;;  %v926_v40 = vpop.f32.mrf.mxu0  ;;  %v975_v41 = vpop.f32.mrf.mxu1 }
 0x138   : > { %1313 = vmatmul.bf16.vlgmr.msra.gmra.mxu3 %v1043_v37  ;;  %1411 = vmatmul.bf16.vlgmr.msra.gmra.mxu1 %v1043_v37  ;;  %v927_v45 = vadd.f32 %v926_v40, %v2527_v24 }
 0x139   : > { %v1012_v43 = vmax.f32 %v875_v39, 0.0 }
 0x13a   : > { %v976_v50 = vadd.f32 %v975_v41, %v927_v45 }
 0x13b   : > { %v1042_v44 = vpack.c.bf16 %v1012_v43, %v1010_v42 }
 0x13c   : > { %v828_v46 = vpop.f32.mrf.mxu2  ;;  %v877_v47 = vpop.f32.mrf.mxu3  ;;  %v1015_v54 = vmax.f32 %v976_v50, 0.0 }
 0x13d   : > { %1264 = vmatmul.bf16.vlgmr.msra.gmra.mxu2 %v1042_v44  ;;  %1362 = vmatmul.bf16.vlgmr.msra.gmra.mxu0 %v1042_v44  ;;  %v829_v52 = vadd.f32 %v828_v46, %v2530_v10 }
 0x13f   : > { %v928_v48 = vpop.f32.mrf.mxu0  ;;  %v977_v49 = vpop.f32.mrf.mxu1  ;;  %v878_v61 = vadd.f32 %v877_v47, %v829_v52 }
 0x140   : > { %v929_v51 = vadd.f32 %v928_v48, %v2527_v24 }
 0x141   : > { %v1014_v4 = vmax.f32 %v878_v61, 0.0 }
 0x142   : > { %v978_v53 = vadd.f32 %v977_v49, %v929_v51 }
 0x144   : > { %v1017_v55 = vmax.f32 %v978_v53, 0.0  ;;  %v830_v57 = vpop.f32.mrf.mxu2  ;;  %v879_v58 = vpop.f32.mrf.mxu3 }
 0x145   : > { %v831_v62 = vadd.f32 %v830_v57, %v2530_v10 }
 0x146   : > { %v1045_v63 = vpack.c.bf16 %v1017_v55, %v1015_v54 }
 0x147   : > { %v880_v0 = vadd.f32 %v879_v58, %v831_v62  ;;  %v931_v1 = vpop.f32.mrf.mxu0  ;;  %v980_v3 = vpop.f32.mrf.mxu1 }
 0x148   : > { %1318 = vmatmul.bf16.gmra.mxu3 %v1045_v63  ;;  %1416 = vmatmul.bf16.gmra.mxu1 %v1045_v63  ;;  %v932_v7 = vadd.f32 %v931_v1, %v2527_v24 }
 0x149   : > { %v1016_v5 = vmax.f32 %v880_v0, 0.0 }
 0x14a   : > { %v981_v11 = vadd.f32 %v980_v3, %v932_v7 }
 0x14b   : > { %v1044_v6 = vpack.c.bf16 %v1016_v5, %v1014_v4 }
 0x14c   : > { %v833_v8 = vpop.f32.mrf.mxu2  ;;  %v882_v9 = vpop.f32.mrf.mxu3  ;;  %v1019_v15 = vmax.f32 %v981_v11, 0.0 }
 0x14d   : > { %1269 = vmatmul.bf16.gmra.mxu2 %v1044_v6  ;;  %1367 = vmatmul.bf16.gmra.mxu0 %v1044_v6  ;;  %v834_v13 = vadd.f32 %v833_v8, %v2530_v10 }
 0x14f   : > { %v933_v59 = vpop.f32.mrf.mxu0  ;;  %v982_v60 = vpop.f32.mrf.mxu1  ;;  %v883_v20 = vadd.f32 %v882_v9, %v834_v13 }
 0x150   : > { %v934_v12 = vadd.f32 %v933_v59, %v2527_v24 }
 0x151   : > { %v1018_v26 = vmax.f32 %v883_v20, 0.0 }
 0x152   : > { %v983_v14 = vadd.f32 %v982_v60, %v934_v12 }
 0x154   : > { %v1021_v16 = vmax.f32 %v983_v14, 0.0  ;;  %v835_v17 = vpop.f32.mrf.mxu2  ;;  %v884_v19 = vpop.f32.mrf.mxu3 }
 0x155   : > { %v836_v21 = vadd.f32 %v835_v17, %v2530_v10 }
 0x156   : > { %v1047_v56 = vpack.c.bf16 %v1021_v16, %v1019_v15 }
 0x157   : > { %v885_v22 = vadd.f32 %v884_v19, %v836_v21  ;;  %v936_v23 = vpop.f32.mrf.mxu0  ;;  %v985_v25 = vpop.f32.mrf.mxu1 }
 0x158   : > { %1323 = vmatmul.bf16.gmra.mxu3 %v1047_v56  ;;  %1421 = vmatmul.bf16.gmra.mxu1 %v1047_v56  ;;  %v937_v18 = vadd.f32 %v936_v23, %v2527_v24 }
 0x159   : > { %v1020_v27 = vmax.f32 %v885_v22, 0.0 }
 0x15a   : > { %v986_v29 = vadd.f32 %v985_v25, %v937_v18 }
 0x15b   : > { %v1046_v38 = vpack.c.bf16 %v1020_v27, %v1018_v26 }
 0x15c   : > { %v838_v2 = vpop.f32.mrf.mxu2  ;;  %v887_v28 = vpop.f32.mrf.mxu3  ;;  %v1023_v35 = vmax.f32 %v986_v29, 0.0 }
 0x15d   : > { %1274 = vmatmul.bf16.gmra.mxu2 %v1046_v38  ;;  %1372 = vmatmul.bf16.gmra.mxu0 %v1046_v38  ;;  %v839_v33 = vadd.f32 %v838_v2, %v2530_v10 }
 0x15f   : > { %v938_v30 = vpop.f32.mrf.mxu0  ;;  %v987_v31 = vpop.f32.mrf.mxu1  ;;  %v888_v40 = vadd.f32 %v887_v28, %v839_v33 }
 0x160   : > { %v939_v32 = vadd.f32 %v938_v30, %v2527_v24 }
 0x161   : > { %v1022_v46 = vmax.f32 %v888_v40, 0.0 }
 0x162   : > { %v988_v34 = vadd.f32 %v987_v31, %v939_v32 }
 0x164   : > { %v1025_v36 = vmax.f32 %v988_v34, 0.0  ;;  %v840_v37 = vpop.f32.mrf.mxu2  ;;  %v889_v39 = vpop.f32.mrf.mxu3 }
 0x165   : > { %v841_v41 = vadd.f32 %v840_v37, %v2530_v10 }
 0x166   : > { %v1049_v42 = vpack.c.bf16 %v1025_v36, %v1023_v35 }
 0x167   : > { %v890_v43 = vadd.f32 %v889_v39, %v841_v41  ;;  %v941_v44 = vpop.f32.mrf.mxu0  ;;  %v990_v45 = vpop.f32.mrf.mxu1 }
 0x168   : > { %1328 = vmatmul.bf16.gmra.mxu3 %v1049_v42  ;;  %1426 = vmatmul.bf16.gmra.mxu1 %v1049_v42  ;;  %v942_v49 = vadd.f32 %v941_v44, %v2527_v24 }
 0x169   : > { %v1024_v47 = vmax.f32 %v890_v43, 0.0 }
 0x16a   : > { %v991_v54 = vadd.f32 %v990_v45, %v942_v49 }
 0x16b   : > { %v1048_v48 = vpack.c.bf16 %v1024_v47, %v1022_v46 }
 0x16c   : > { %v843_v50 = vpop.f32.mrf.mxu2  ;;  %v892_v51 = vpop.f32.mrf.mxu3  ;;  %v1027_v61 = vmax.f32 %v991_v54, 0.0 }
 0x16d   : > { %1279 = vmatmul.bf16.gmra.mxu2 %v1048_v48  ;;  %1377 = vmatmul.bf16.gmra.mxu0 %v1048_v48  ;;  %v844_v57 = vadd.f32 %v843_v50, %v2530_v10 }
 0x16f   : > { %v943_v52 = vpop.f32.mrf.mxu0  ;;  %v992_v53 = vpop.f32.mrf.mxu1  ;;  %v893_v1 = vadd.f32 %v892_v51, %v844_v57 }
 0x170   : > { %v944_v55 = vadd.f32 %v943_v52, %v2527_v24 }
 0x171   : > { %v1026_v8 = vmax.f32 %v893_v1, 0.0 }
 0x172   : > { %v993_v58 = vadd.f32 %v992_v53, %v944_v55 }
 0x174   : > { %v1029_v62 = vmax.f32 %v993_v58, 0.0  ;;  %v845_v63 = vpop.f32.mrf.mxu2  ;;  %v894_v0 = vpop.f32.mrf.mxu3 }
 0x175   : > { %v846_v3 = vadd.f32 %v845_v63, %v2530_v10 }
 0x176   : > { %v1051_v4 = vpack.c.bf16 %v1029_v62, %v1027_v61 }
 0x177   : > { %v895_v5 = vadd.f32 %v894_v0, %v846_v3  ;;  %v946_v6 = vpop.f32.mrf.mxu0  ;;  %v995_v7 = vpop.f32.mrf.mxu1 }
 0x178   : > { %1333 = vmatmul.bf16.gmra.mxu3 %v1051_v4  ;;  %1431 = vmatmul.bf16.gmra.mxu1 %v1051_v4  ;;  %v947_v60 = vadd.f32 %v946_v6, %v2527_v24 }
 0x179   : > { %v1028_v9 = vmax.f32 %v895_v5, 0.0 }
 0x17a   : > { %v996_v15 = vadd.f32 %v995_v7, %v947_v60 }
 0x17b   : > { %v1050_v59 = vpack.c.bf16 %v1028_v9, %v1026_v8 }
 0x17c   : > { %v848_v11 = vpop.f32.mrf.mxu2  ;;  %v897_v12 = vpop.f32.mrf.mxu3  ;;  %v1031_v20 = vmax.f32 %v996_v15, 0.0 }
 0x17d   : > { %1284 = vmatmul.bf16.gmra.mxu2 %v1050_v59  ;;  %1382 = vmatmul.bf16.gmra.mxu0 %v1050_v59  ;;  %v849_v17 = vadd.f32 %v848_v11, %v2530_v10 }
 0x17f   : > { %v948_v13 = vpop.f32.mrf.mxu0  ;;  %v997_v14 = vpop.f32.mrf.mxu1  ;;  %v898_v23 = vadd.f32 %v897_v12, %v849_v17 }
 0x180   : > { %v949_v16 = vadd.f32 %v948_v13, %v2527_v24 }
 0x181   : > { %v1030_v2 = vmax.f32 %v898_v23, 0.0 }
 0x182   : > { %v998_v19 = vadd.f32 %v997_v14, %v949_v16 }
 0x184   : > { %v1033_v21 = vmax.f32 %v998_v19, 0.0  ;;  %v850_v56 = vpop.f32.mrf.mxu2  ;;  %v899_v22 = vpop.f32.mrf.mxu3 }
 0x185   : > { %v851_v25 = vadd.f32 %v850_v56, %v2530_v10 }
 0x186   : > { %v1053_v26 = vpack.c.bf16 %v1033_v21, %v1031_v20  ;;  %v1484_v20 = vld [vmem:[%s2707_s7] sm:$0x3] }
 0x187   : > { %v900_v27 = vadd.f32 %v899_v22, %v851_v25  ;;  %v951_v38 = vpop.f32.mrf.mxu0  ;;  %v1000_v18 = vpop.f32.mrf.mxu1  ;;  %v2575_v23 = vperm.slane %v1484_v20, 1 }
 0x188   : > { %1338 = vmatmul.bf16.gmra.mxu3 %v1053_v26  ;;  %1436 = vmatmul.bf16.gmra.mxu1 %v1053_v26  ;;  %v952_v31 = vadd.f32 %v951_v38, %v2527_v24 }
 0x189   : > { %v1032_v28 = vmax.f32 %v900_v27, 0.0 }
 0x18a   : > { %v1001_v35 = vadd.f32 %v1000_v18, %v952_v31  ;;  %v2578_v18 = vperm.slane %v1484_v20, 0 }
 0x18b   : > { %v1052_v30 = vpack.c.bf16 %v1032_v28, %v1030_v2 }
 0x18c   : > { %v853_v29 = vpop.f32.mrf.mxu2  ;;  %v902_v32 = vpop.f32.mrf.mxu3  ;;  %v1035_v40 = vmax.f32 %v1001_v35, 0.0 }
 0x18d   : > { %1289 = vmatmul.bf16.gmra.mxu2 %v1052_v30  ;;  %1387 = vmatmul.bf16.gmra.mxu0 %v1052_v30  ;;  %v854_v37 = vadd.f32 %v853_v29, %v2530_v10 }
 0x18f   : > { %v953_v33 = vpop.f32.mrf.mxu0  ;;  %v1002_v34 = vpop.f32.mrf.mxu1  ;;  %v903_v44 = vadd.f32 %v902_v32, %v854_v37 }
 0x190   : > { %v954_v36 = vadd.f32 %v953_v33, %v2527_v24 }
 0x191   : > { %v1034_v50 = vmax.f32 %v903_v44, 0.0 }
 0x192   : > { %v1003_v39 = vadd.f32 %v1002_v34, %v954_v36 }
 0x194   : > { %v1037_v41 = vmax.f32 %v1003_v39, 0.0  ;;  %v855_v42 = vpop.f32.mrf.mxu2  ;;  %v904_v43 = vpop.f32.mrf.mxu3 }
 0x195   : > { %v856_v45 = vadd.f32 %v855_v42, %v2530_v10 }
 0x196   : > { %v1055_v46 = vpack.c.bf16 %v1037_v41, %v1035_v40 }
 0x197   : > { %v905_v47 = vadd.f32 %v904_v43, %v856_v45  ;;  %v956_v48 = vpop.f32.mrf.mxu0  ;;  %v1005_v49 = vpop.f32.mrf.mxu1 }
 0x198   : > { %1343 = vmatmul.bf16.gmra.mxu3 %v1055_v46  ;;  %1441 = vmatmul.bf16.gmra.mxu1 %v1055_v46  ;;  %v957_v53 = vadd.f32 %v956_v48, %v2527_v24 }
 0x199   : > { %v1036_v51 = vmax.f32 %v905_v47, 0.0 }
 0x19a   : > { %v1006_v58 = vadd.f32 %v1005_v49, %v957_v53 }
 0x19b   : > { %v1054_v52 = vpack.c.bf16 %v1036_v51, %v1034_v50 }
 0x19c   : > { %v858_v54 = vpop.f32.mrf.mxu2  ;;  %v907_v55 = vpop.f32.mrf.mxu3  ;;  %v1039_v1 = vmax.f32 %v1006_v58, 0.0 }
 0x19d   : > { %1294 = vmatmul.bf16.gmra.mxu2 %v1054_v52  ;;  %1392 = vmatmul.bf16.gmra.mxu0 %v1054_v52  ;;  %v859_v62 = vadd.f32 %v858_v54, %v2530_v10 }
 0x19f   : > { %v958_v57 = vpop.f32.mrf.mxu0  ;;  %v1007_v63 = vpop.f32.mrf.mxu1  ;;  %v908_v5 = vadd.f32 %v907_v55, %v859_v62 }
 0x1a0   : > { %v959_v61 = vadd.f32 %v958_v57, %v2527_v24  ;;  %v1090_v24 = vld [vmem:[%s2706_s6] sm:$0x3] }
 0x1a1   : > { %v1038_v59 = vmax.f32 %v908_v5, 0.0  ;;  %v2566_v13 = vperm.slane %v1090_v24, 1  ;;  %v2569_v17 = vperm.slane %v1090_v24, 0 }
 0x1a2   : > { %v1008_v0 = vadd.f32 %v1007_v63, %v959_v61 }
 0x1a4   : > { %v1041_v3 = vmax.f32 %v1008_v0, 0.0  ;;  %v860_v4 = vpop.f32.mrf.mxu2  ;;  %v909_v8 = vpop.f32.mrf.mxu3 }
 0x1a5   : > { %v861_v6 = vadd.f32 %v860_v4, %v2530_v10 }
 0x1a6   : > { %v1057_v7 = vpack.c.bf16 %v1041_v3, %v1039_v1 }
 0x1a7   : > { %v910_v9 = vadd.f32 %v909_v8, %v861_v6 }
 0x1a8   : > { %1348 = vmatmul.bf16.gmra.mxu3 %v1057_v7  ;;  %1446 = vmatmul.bf16.gmra.mxu1 %v1057_v7 }
 0x1a9   : > { %v1040_v60 = vmax.f32 %v910_v9, 0.0 }
 0x1ab   : > { %v1056_v11 = vpack.c.bf16 %v1040_v60, %v1038_v59 }
 0x1ad   : > { %1299 = vmatmul.bf16.gmra.mxu2 %v1056_v11 }
 0x1b5   : > { %v1412_v12 = vpop.f32.mrf.mxu1 }
 0x1ba   : > { %v1363_v14 = vpop.f32.mrf.mxu0 }
 0x1bb   : > { %v1314_v15 = vpop.f32.mrf.mxu3  ;;  %v1364_v10 = vadd.f32 %v1363_v14, %v2566_v13 }
 0x1bd   : > { %v1414_v16 = vpop.f32.mrf.mxu1  ;;  %1397 = vmatmul.bf16.vlgmr.msrb.gmra.mxu2 %v1056_v11  ;;  %v1413_v19 = vadd.f32 %v1412_v12, %v1364_v10 }
 0x1bf   : > { %v1453_v25 = vmax.f32 %v1413_v19, 0.0 }
 0x1c0   : > { %v1265_v21 = vpop.f32.mrf.mxu2 }
 0x1c1   : > { %v1266_v56 = vadd.f32 %v1265_v21, %v2569_v17  ;;  %v1491_v29 = vmul.f32 %v2575_v23, %v1453_v25 }
 0x1c2   : > { %v1365_v22 = vpop.f32.mrf.mxu0 }
 0x1c3   : > { %v1315_v26 = vadd.f32 %v1314_v15, %v1266_v56  ;;  %v1316_v27 = vpop.f32.mrf.mxu3  ;;  %v1366_v38 = vadd.f32 %v1365_v22, %v2566_v13 }
 0x1c5   : > { %v1452_v2 = vmax.f32 %v1315_v26, 0.0  ;;  %v1417_v28 = vpop.f32.mrf.mxu1  ;;  %v1415_v30 = vadd.f32 %v1414_v16, %v1366_v38 }
 0x1c7   : > { %v1490_v31 = vmul.f32 %v2578_v18, %v1452_v2  ;;  %v1455_v36 = vmax.f32 %v1415_v30, 0.0 }
 0x1c8   : > { %v1267_v32 = vpop.f32.mrf.mxu2 }
 0x1c9   : > { %v1268_v33 = vadd.f32 %v1267_v32, %v2569_v17  ;;  %v1522_v34 = vadd.f32 %v1491_v29, %v1490_v31  ;;  %v1493_v45 = vmul.f32 %v2575_v23, %v1455_v36 }
 0x1ca   : > { %v1368_v35 = vpop.f32.mrf.mxu0 }
 0x1cb   : > { %v1317_v37 = vadd.f32 %v1316_v27, %v1268_v33  ;;  %v1319_v39 = vpop.f32.mrf.mxu3  ;;  %v1369_v40 = vadd.f32 %v1368_v35, %v2566_v13  ;;  %1523 = vadd.xlane.f32.xlu0 %v1522_v34 }
 0x1cd   : > { %v1454_v41 = vmax.f32 %v1317_v37, 0.0  ;;  %v1419_v42 = vpop.f32.mrf.mxu1  ;;  %v1418_v43 = vadd.f32 %v1417_v28, %v1369_v40 }
 0x1cf   : > { %v1492_v44 = vmul.f32 %v2578_v18, %v1454_v41  ;;  %v1457_v50 = vmax.f32 %v1418_v43, 0.0 }
 0x1d0   : > { %v1270_v46 = vpop.f32.mrf.mxu2 }
 0x1d1   : > { %v1271_v47 = vadd.f32 %v1270_v46, %v2569_v17  ;;  %v1525_v48 = vadd.f32 %v1493_v45, %v1492_v44  ;;  %v1495_v61 = vmul.f32 %v2575_v23, %v1457_v50 }
 0x1d2   : > { %v1370_v49 = vpop.f32.mrf.mxu0 }
 0x1d3   : > { %v1320_v51 = vadd.f32 %v1319_v39, %v1271_v47  ;;  %v1321_v52 = vpop.f32.mrf.mxu3  ;;  %v1371_v53 = vadd.f32 %v1370_v49, %v2566_v13  ;;  %1526 = vadd.xlane.f32.xlu0 %v1525_v48 }
 0x1d5   : > { %v1456_v54 = vmax.f32 %v1320_v51, 0.0  ;;  %v1422_v55 = vpop.f32.mrf.mxu1  ;;  %v1420_v57 = vadd.f32 %v1419_v42, %v1371_v53 }
 0x1d7   : > { %v1494_v58 = vmul.f32 %v2578_v18, %v1456_v54  ;;  %v1459_v3 = vmax.f32 %v1420_v57, 0.0 }
 0x1d8   : > { %v1272_v62 = vpop.f32.mrf.mxu2 }
 0x1d9   : > { %v1273_v63 = vadd.f32 %v1272_v62, %v2569_v17  ;;  %v1528_v0 = vadd.f32 %v1495_v61, %v1494_v58  ;;  %v1497_v60 = vmul.f32 %v2575_v23, %v1459_v3 }
 0x1da   : > { %v1373_v1 = vpop.f32.mrf.mxu0 }
 0x1db   : > { %v1322_v4 = vadd.f32 %v1321_v52, %v1273_v63  ;;  %v1324_v5 = vpop.f32.mrf.mxu3  ;;  %v1374_v6 = vadd.f32 %v1373_v1, %v2566_v13  ;;  %1529 = vadd.xlane.f32.xlu1 %v1528_v0 }
 0x1dd   : > { %v1458_v7 = vmax.f32 %v1322_v4, 0.0  ;;  %v1424_v8 = vpop.f32.mrf.mxu1  ;;  %v1423_v9 = vadd.f32 %v1422_v55, %v1374_v6 }
 0x1df   : > { %v1496_v59 = vmul.f32 %v2578_v18, %v1458_v7  ;;  %v1461_v15 = vmax.f32 %v1423_v9, 0.0 }
 0x1e0   : > { %v1275_v11 = vpop.f32.mrf.mxu2 }
 0x1e1   : > { %v1276_v24 = vadd.f32 %v1275_v11, %v2569_v17  ;;  %v1531_v12 = vadd.f32 %v1497_v60, %v1496_v59  ;;  %v1499_v25 = vmul.f32 %v2575_v23, %v1461_v15 }
 0x1e2   : > { %v1375_v14 = vpop.f32.mrf.mxu0 }
 0x1e3   : > { %v1325_v10 = vadd.f32 %v1324_v5, %v1276_v24  ;;  %v1326_v16 = vpop.f32.mrf.mxu3  ;;  %v1376_v19 = vadd.f32 %v1375_v14, %v2566_v13  ;;  %1532 = vadd.xlane.f32.xlu1 %v1531_v12 }
 0x1e5   : > { %v1460_v20 = vmax.f32 %v1325_v10, 0.0  ;;  %v1427_v21 = vpop.f32.mrf.mxu1  ;;  %v1425_v56 = vadd.f32 %v1424_v8, %v1376_v19 }
 0x1e7   : > { %v1498_v22 = vmul.f32 %v2578_v18, %v1460_v20  ;;  %v1463_v28 = vmax.f32 %v1425_v56, 0.0 }
 0x1e8   : > { %v1277_v26 = vpop.f32.mrf.mxu2 }
 0x1e9   : > { %v1278_v27 = vadd.f32 %v1277_v26, %v2569_v17  ;;  %v1534_v38 = vadd.f32 %v1499_v25, %v1498_v22  ;;  %v1501_v36 = vmul.f32 %v2575_v23, %v1463_v28 }
 0x1ea   : > { %v1378_v2 = vpop.f32.mrf.mxu0 }
 0x1eb   : > { %v1327_v30 = vadd.f32 %v1326_v16, %v1278_v27  ;;  %v1329_v31 = vpop.f32.mrf.mxu3  ;;  %v1379_v29 = vadd.f32 %v1378_v2, %v2566_v13  ;;  %1535 = vadd.xlane.f32.xlu2 %v1534_v38 }
 0x1ed   : > { %v1462_v32 = vmax.f32 %v1327_v30, 0.0  ;;  %v1429_v33 = vpop.f32.mrf.mxu1  ;;  %v1428_v34 = vadd.f32 %v1427_v21, %v1379_v29 }
 0x1ef   : > { %v1500_v35 = vmul.f32 %v2578_v18, %v1462_v32  ;;  %v1465_v42 = vmax.f32 %v1428_v34, 0.0 }
 0x1f0   : > { %v1280_v37 = vpop.f32.mrf.mxu2 }
 0x1f1   : > { %v1281_v39 = vadd.f32 %v1280_v37, %v2569_v17  ;;  %v1537_v40 = vadd.f32 %v1501_v36, %v1500_v35  ;;  %v1503_v50 = vmul.f32 %v2575_v23, %v1465_v42 }
 0x1f2   : > { %v1380_v41 = vpop.f32.mrf.mxu0 }
 0x1f3   : > { %v1330_v43 = vadd.f32 %v1329_v31, %v1281_v39  ;;  %v1331_v44 = vpop.f32.mrf.mxu3  ;;  %v1381_v45 = vadd.f32 %v1380_v41, %v2566_v13  ;;  %1538 = vadd.xlane.f32.xlu2 %v1537_v40 }
 0x1f5   : > { %v1464_v46 = vmax.f32 %v1330_v43, 0.0  ;;  %v1432_v47 = vpop.f32.mrf.mxu1  ;;  %v1430_v48 = vadd.f32 %v1429_v33, %v1381_v45 }
 0x1f7   : > { %v1502_v49 = vmul.f32 %v2578_v18, %v1464_v46  ;;  %v1467_v55 = vmax.f32 %v1430_v48, 0.0 }
 0x1f8   : > { %v1282_v51 = vpop.f32.mrf.mxu2 }
 0x1f9   : > { %v1283_v52 = vadd.f32 %v1282_v51, %v2569_v17  ;;  %v1540_v53 = vadd.f32 %v1503_v50, %v1502_v49  ;;  %v1505_v3 = vmul.f32 %v2575_v23, %v1467_v55 }
 0x1fa   : > { %v1383_v54 = vpop.f32.mrf.mxu0 }
 0x1fb   : > { %v1332_v57 = vadd.f32 %v1331_v44, %v1283_v52  ;;  %v1334_v58 = vpop.f32.mrf.mxu3  ;;  %v1384_v61 = vadd.f32 %v1383_v54, %v2566_v13  ;;  %1541 = vadd.xlane.f32.xlu0 %v1540_v53 }
 0x1fd   : > { %v1466_v62 = vmax.f32 %v1332_v57, 0.0  ;;  %v1434_v63 = vpop.f32.mrf.mxu1  ;;  %v1433_v0 = vadd.f32 %v1432_v47, %v1384_v61 }
 0x1ff   : > { %v1504_v1 = vmul.f32 %v2578_v18, %v1466_v62  ;;  %v1469_v8 = vmax.f32 %v1433_v0, 0.0 }
 0x200   : > { %v1285_v4 = vpop.f32.mrf.mxu2 }
 0x201   : > { %v1286_v5 = vadd.f32 %v1285_v4, %v2569_v17  ;;  %v1543_v6 = vadd.f32 %v1505_v3, %v1504_v1  ;;  %v1507_v14 = vmul.f32 %v2575_v23, %v1469_v8 }
 0x202   : > { %v1385_v7 = vpop.f32.mrf.mxu0 }
 0x203   : > { %v1335_v9 = vadd.f32 %v1334_v58, %v1286_v5  ;;  %v1336_v59 = vpop.f32.mrf.mxu3  ;;  %v1386_v60 = vadd.f32 %v1385_v7, %v2566_v13  ;;  %1544 = vadd.xlane.f32.xlu1 %v1543_v6 }
 0x205   : > { %v1468_v11 = vmax.f32 %v1335_v9, 0.0  ;;  %v1435_v24 = vadd.f32 %v1434_v63, %v1386_v60  ;;  %v1437_v15 = vpop.f32.mrf.mxu1 }
 0x207   : > { %v1506_v12 = vmul.f32 %v2578_v18, %v1468_v11  ;;  %v1471_v21 = vmax.f32 %v1435_v24, 0.0 }
 0x208   : > { %v1287_v10 = vpop.f32.mrf.mxu2 }
 0x209   : > { %v1288_v16 = vadd.f32 %v1287_v10, %v2569_v17  ;;  %v1546_v19 = vadd.f32 %v1507_v14, %v1506_v12  ;;  %v1509_v2 = vmul.f32 %v2575_v23, %v1471_v21 }
 0x20a   : > { %v1388_v20 = vpop.f32.mrf.mxu0 }
 0x20b   : > { %v1337_v56 = vadd.f32 %v1336_v59, %v1288_v16  ;;  %v1389_v22 = vadd.f32 %v1388_v20, %v2566_v13  ;;  %1547 = vadd.xlane.f32.xlu2 %v1546_v19  ;;  %v1339_v25 = vpop.f32.mrf.mxu3  ;;  %v2635_v20 = vld [vmem:[#allocation2] ss:$0 sm:$0xff] }
 0x20d   : > { %v1470_v26 = vmax.f32 %v1337_v56, 0.0  ;;  %v1438_v27 = vadd.f32 %v1437_v15, %v1389_v22  ;;  %v1439_v29 = vpop.f32.mrf.mxu1 }
 0x20f   : > { %v1508_v38 = vmul.f32 %v2578_v18, %v1470_v26  ;;  %v1473_v33 = vmax.f32 %v1438_v27, 0.0 }
 0x210   : > { %v1290_v28 = vpop.f32.mrf.mxu2 }
 0x211   : > { %v1291_v30 = vadd.f32 %v1290_v28, %v2569_v17  ;;  %v1549_v31 = vadd.f32 %v1509_v2, %v1508_v38  ;;  %v1511_v41 = vmul.f32 %v2575_v23, %v1473_v33 }
 0x212   : > { %v1390_v32 = vpop.f32.mrf.mxu0 }
 0x213   : > { %v1340_v34 = vadd.f32 %v1339_v25, %v1291_v30  ;;  %v1391_v35 = vadd.f32 %v1390_v32, %v2566_v13  ;;  %1550 = vadd.xlane.f32.xlu0 %v1549_v31  ;;  %v1341_v37 = vpop.f32.mrf.mxu3 }
 0x215   : > { %v1472_v36 = vmax.f32 %v1340_v34, 0.0  ;;  %v1440_v39 = vadd.f32 %v1439_v29, %v1391_v35  ;;  %v1442_v49 = vpop.f32.mrf.mxu1 }
 0x217   : > { %v1510_v40 = vmul.f32 %v2578_v18, %v1472_v36  ;;  %v1475_v46 = vmax.f32 %v1440_v39, 0.0 }
 0x218   : > { %v1292_v42 = vpop.f32.mrf.mxu2 }
 0x219   : > { %v1293_v43 = vadd.f32 %v1292_v42, %v2569_v17  ;;  %v1552_v44 = vadd.f32 %v1511_v41, %v1510_v40  ;;  %v1513_v53 = vmul.f32 %v2575_v23, %v1475_v46 }
 0x21a   : > { %v1393_v45 = vpop.f32.mrf.mxu0 }
 0x21b   : > { %v1342_v47 = vadd.f32 %v1341_v37, %v1293_v43  ;;  %v1394_v48 = vadd.f32 %v1393_v45, %v2566_v13  ;;  %1553 = vadd.xlane.f32.xlu1 %v1552_v44  ;;  %v1344_v54 = vpop.f32.mrf.mxu3 }
 0x21d   : > { %v1474_v50 = vmax.f32 %v1342_v47, 0.0  ;;  %v1443_v51 = vadd.f32 %v1442_v49, %v1394_v48  ;;  %v1444_v3 = vpop.f32.mrf.mxu1 }
 0x21f   : > { %v1512_v52 = vmul.f32 %v2578_v18, %v1474_v50  ;;  %v1477_v62 = vmax.f32 %v1443_v51, 0.0 }
 0x220   : > { %v1295_v55 = vpop.f32.mrf.mxu2 }
 0x221   : > { %v1296_v57 = vadd.f32 %v1295_v55, %v2569_v17  ;;  %v1555_v58 = vadd.f32 %v1513_v53, %v1512_v52  ;;  %v1515_v6 = vmul.f32 %v2575_v23, %v1477_v62 }
 0x222   : > { %v1395_v61 = vpop.f32.mrf.mxu0 }
 0x223   : > { %v1345_v63 = vadd.f32 %v1344_v54, %v1296_v57  ;;  %v1396_v0 = vadd.f32 %v1395_v61, %v2566_v13  ;;  %1556 = vadd.xlane.f32.xlu2 %v1555_v58  ;;  %v1346_v59 = vpop.f32.mrf.mxu3 }
 0x225   : > { %v1476_v1 = vmax.f32 %v1345_v63, 0.0  ;;  %v1445_v4 = vadd.f32 %v1444_v3, %v1396_v0  ;;  %v1447_v26 = vpop.f32.mrf.mxu1 }
 0x227   : > { %v1514_v5 = vmul.f32 %v2578_v18, %v1476_v1  ;;  %v1479_v60 = vmax.f32 %v1445_v4, 0.0 }
 0x228   : > { %v1297_v7 = vpop.f32.mrf.mxu2 }
 0x229   : > { %v1298_v8 = vadd.f32 %v1297_v7, %v2569_v17  ;;  %v1558_v9 = vadd.f32 %v1515_v6, %v1514_v5  ;;  %v1517_v14 = vmul.f32 %v2575_v23, %v1479_v60 }
 0x22b   : > { %v1347_v11 = vadd.f32 %v1346_v59, %v1298_v8  ;;  %1559 = vadd.xlane.f32.xlu0 %v1558_v9  ;;  %v1349_v21 = vpop.f32.mrf.mxu3 }
 0x22d   : > { %v1478_v24 = vmax.f32 %v1347_v11, 0.0 }
 0x22f   : > { %v1516_v12 = vmul.f32 %v2578_v18, %v1478_v24 }
 0x230   : > { %v1300_v15 = vpop.f32.mrf.mxu2 }
 0x231   : > { %v1561_v10 = vadd.f32 %v1517_v14, %v1516_v12  ;;  %v1301_v19 = vadd.f32 %v1300_v15, %v2569_v17 }
 0x233   : > { %1562 = vadd.xlane.f32.xlu1 %v1561_v10  ;;  %v1350_v22 = vadd.f32 %v1349_v21, %v1301_v19  ;;  %v1351_v29 = vpop.f32.mrf.mxu3 }
 0x235   : > { %v1480_v2 = vmax.f32 %v1350_v22, 0.0 }
 0x237   : > { %v1518_v35 = vmul.f32 %v2578_v18, %v1480_v2 }
 0x238   : > { %v1302_v16 = vpop.f32.mrf.mxu2 }
 0x239   : > { %v1303_v28 = vadd.f32 %v1302_v16, %v2569_v17  ;;  %v1449_v17 = vpop.f32.mrf.mxu1 }
 0x23b   : > { %v1352_v33 = vadd.f32 %v1351_v29, %v1303_v28 }
 0x23d   : > { %v1482_v41 = vmax.f32 %v1352_v33, 0.0 }
 0x23e   : > { %v1524_v56 = vpop.xlane.xlu0 %1523 }
 0x23f   : > { %v1574_v25 = vadd.f32 %v2635_v20, %v1524_v56  ;;  %v1520_v46 = vmul.f32 %v2578_v18, %v1482_v41 }
 0x240   : > { %v1398_v27 = vpop.f32.mrf.mxu2 }
 0x241   : > { %1591 = vst.msk [vmem:[%s2640_s16] sm:$0xff] %vm1590_vm2, %v1574_v25  ;;  %v1399_v38 = vadd.f32 %v1398_v27, %v2566_v13 }
 0x243   : > { %v1448_v30 = vadd.f32 %v1447_v26, %v1399_v38 }
 0x245   : > { %v1481_v31 = vmax.f32 %v1448_v30, 0.0 }
 0x246   : > { %v1527_v32 = vpop.xlane.xlu0 %1526 }
 0x247   : > { %v1575_v34 = vadd.f32 %v2635_v20, %v1527_v32  ;;  %v1519_v36 = vmul.f32 %v2575_v23, %v1481_v31 }
 0x248   : > { %v1400_v37 = vpop.f32.mrf.mxu2 }
 0x249   : > { %1592 = vst.msk [vmem:[%s2640_s16 + $0x8] sm:$0xff] %vm1590_vm2, %v1575_v34  ;;  %v1401_v39 = vadd.f32 %v1400_v37, %v2566_v13  ;;  %v1564_v40 = vadd.f32 %v1519_v36, %v1518_v35 }
 0x24b   : > { %v1450_v42 = vadd.f32 %v1449_v17, %v1401_v39  ;;  %1565 = vadd.xlane.f32.xlu2 %v1564_v40 }
 0x24d   : > { %v1483_v43 = vmax.f32 %v1450_v42, 0.0 }
 0x24e   : > { %v1530_v44 = vpop.xlane.xlu1 %1529 }
 0x24f   : > { %v1576_v45 = vadd.f32 %v2635_v20, %v1530_v44  ;;  %v1521_v47 = vmul.f32 %v2575_v23, %v1483_v43 }
 0x251   : > { %1593 = vst.msk [vmem:[%s2640_s16 + $0x10] sm:$0xff] %vm1590_vm2, %v1576_v45  ;;  %v1567_v13 = vadd.f32 %v1521_v47, %v1520_v46 }
 0x253   : > { %1568 = vadd.xlane.f32.xlu0 %v1567_v13 }
 0x256   : > { %v1533_v48 = vpop.xlane.xlu1 %1532 }
 0x257   : > { %v1577_v49 = vadd.f32 %v2635_v20, %v1533_v48 }
 0x259   : > { %1594 = vst.msk [vmem:[%s2640_s16 + $0x18] sm:$0xff] %vm1590_vm2, %v1577_v49 }
 0x25e   : > { %v1536_v50 = vpop.xlane.xlu2 %1535 }
 0x25f   : > { %v1578_v51 = vadd.f32 %v2635_v20, %v1536_v50 }
 0x261   : > { %1595 = vst.msk [vmem:[%s2640_s16 + $0x20] sm:$0xff] %vm1590_vm2, %v1578_v51 }
 0x266   : > { %v1539_v18 = vpop.xlane.xlu2 %1538 }
 0x267   : > { %v1579_v23 = vadd.f32 %v2635_v20, %v1539_v18 }
 0x269   : > { %1596 = vst.msk [vmem:[%s2640_s16 + $0x28] sm:$0xff] %vm1590_vm2, %v1579_v23 }
 0x26e   : > { %v1542_v52 = vpop.xlane.xlu0 %1541 }
 0x26f   : > { %v1580_v53 = vadd.f32 %v2635_v20, %v1542_v52 }
 0x271   : > { %1597 = vst.msk [vmem:[%s2640_s16 + $0x30] sm:$0xff] %vm1590_vm2, %v1580_v53 }
 0x276   : > { %v1545_v54 = vpop.xlane.xlu1 %1544 }
 0x277   : > { %v1581_v55 = vadd.f32 %v2635_v20, %v1545_v54 }
 0x279   : > { %1598 = vst.msk [vmem:[%s2640_s16 + $0x38] sm:$0xff] %vm1590_vm2, %v1581_v55 }
 0x27e   : > { %v1548_v57 = vpop.xlane.xlu2 %1547 }
 0x27f   : > { %v1582_v58 = vadd.f32 %v2635_v20, %v1548_v57 }
 0x281   : > { %1599 = vst.msk [vmem:[%s2640_s16 + $0x40] sm:$0xff] %vm1590_vm2, %v1582_v58 }
 0x286   : > { %v1551_v61 = vpop.xlane.xlu0 %1550 }
 0x287   : > { %v1583_v62 = vadd.f32 %v2635_v20, %v1551_v61 }
 0x289   : > { %1600 = vst.msk [vmem:[%s2640_s16 + $0x48] sm:$0xff] %vm1590_vm2, %v1583_v62 }
 0x28e   : > { %v1554_v63 = vpop.xlane.xlu1 %1553 }
 0x28f   : > { %v1584_v0 = vadd.f32 %v2635_v20, %v1554_v63 }
 0x291   : > { %1601 = vst.msk [vmem:[%s2640_s16 + $0x50] sm:$0xff] %vm1590_vm2, %v1584_v0 }
 0x296   : > { %v1557_v1 = vpop.xlane.xlu2 %1556 }
 0x297   : > { %v1585_v3 = vadd.f32 %v2635_v20, %v1557_v1 }
 0x299   : > { %1602 = vst.msk [vmem:[%s2640_s16 + $0x58] sm:$0xff] %vm1590_vm2, %v1585_v3 }
 0x29e   : > { %v1560_v4 = vpop.xlane.xlu0 %1559 }
 0x29f   : > { %v1586_v5 = vadd.f32 %v2635_v20, %v1560_v4 }
 0x2a1   : > { %1603 = vst.msk [vmem:[%s2640_s16 + $0x60] sm:$0xff] %vm1590_vm2, %v1586_v5 }
 0x2a6   : > { %v1563_v6 = vpop.xlane.xlu1 %1562 }
 0x2a7   : > { %v1587_v7 = vadd.f32 %v2635_v20, %v1563_v6 }
 0x2a9   : > { %1604 = vst.msk [vmem:[%s2640_s16 + $0x68] sm:$0xff] %vm1590_vm2, %v1587_v7 }
 0x2be   : > { %v1566_v8 = vpop.xlane.xlu2 %1565 }
 0x2bf   : > { %v1588_v9 = vadd.f32 %v2635_v20, %v1566_v8 }
 0x2c1   : > { %1605 = vst.msk [vmem:[%s2640_s16 + $0x70] sm:$0xff] %vm1590_vm2, %v1588_v9 }
 0x2c6   : > { %v1569_v59 = vpop.xlane.xlu0 %1568 }
 0x2c7   : > { %v1589_v60 = vadd.f32 %v2635_v20, %v1569_v59 }
 0x2c9   : > { %1606 = vst.msk [vmem:[%s2640_s16 + $0x78] sm:$0xff] %vm1590_vm2, %v1589_v60 }
 0x2ca PF: > { %s22_s11 = sadd.s32 1, %s2149_s11  }
 0x2cb   : > { %p19_p7 = scmp.ge.s32.totalorder %s22_s11, 4  }
 0x2cd   :  { %21 = sbr.rel (!%p19_p7) target bundleno = 4 (0x4), region = 91 }
 0x2d2   :  { %1629 = vsyncpa [#allocation4], 1 }
 0x2d3   :  { %1631 = vsyncpa [#allocation4 + $0x1], 1 }

</bundles_post_ra>
